<compile_context>
chip_gen: v6e
topology: v6e:2x2x1
jax: 0.10.0
libtpu: 0.0.40
codegen_flags: <defaults>
</compile_context>

<pallas_src>
import functools

import jax
import jax.numpy as jnp
from jax.experimental import pallas as pl
from jax.experimental.pallas import tpu as pltpu


# ----------------------------- kernel ------------------------------------- #
def _rms_norm(x, g, eps):
    # x: (..., C); math in f32, g broadcasts against the last dim.
    xf = x.astype(jnp.float32)
    ms = jnp.mean(xf * xf, axis=-1, keepdims=True)
    return xf * jax.lax.rsqrt(ms + eps) * g


def transformer_kernel(
    x_hbm,       # (B, N, C)        f32  tokens, raw HBM ref (memory_space=pl.ANY)
    wqkv_ref,    # (1, C, 3C)       bf16 fused q|k|v weights ([in, out])
    wproj_ref,   # (1, C, C)        bf16 attention output projection
    wfc13_ref,   # (1, 1, C, 2*Ft)  bf16 fused fc1|fc3 chunk ([in, out])
    wfc2_ref,    # (1, 1, Ft, C)    bf16 fc2 chunk ([in, out])
    g1_ref,      # (1, 1, C)        f32  norm_1 weight
    g2_ref,      # (1, 1, C)        f32  norm_2 weight
    gpost_ref,   # (1, C)           f32  post_trunk_norm weight
    out_ref,     # (TB, N, C)       f32  output; also the residual-stream carry
    attn_sc,     # (TB, N, C)       bf16 per-head attention outputs (concat-free)
    xn2_sc,      # (TB, N, C)       bf16 norm_2(x), reused across F chunks
    acc_sc,      # (TB, N, C)       f32  FFN output accumulator over F chunks
    dma_sem,     # ()               DMA semaphore for the token seed copy
    *,
    num_heads,
    eps,
):
    b_idx = pl.program_id(0)
    layer = pl.program_id(1)
    f_idx = pl.program_id(2)
    n_layers = pl.num_programs(1)
    n_f = pl.num_programs(2)

    TB, N, C = out_ref.shape
    Dh = C // num_heads
    scale = 1.0 / (Dh ** 0.5)
    Ft = wfc2_ref.shape[2]

    # ---- seed the residual carry from HBM once per batch tile --------------
    @pl.when((layer == 0) & (f_idx == 0))
    def _():
        cp = pltpu.make_async_copy(
            x_hbm.at[pl.ds(b_idx * TB, TB)], out_ref, dma_sem)
        cp.start()
        cp.wait()

    # ---- attention branch + norm_2 precompute: once per (tile, layer) ------
    @pl.when(f_idx == 0)
    def _():
        x = out_ref[...]                                   # (TB, N, C) f32
        xn = _rms_norm(x, g1_ref[0], eps)
        xnf = xn.reshape(TB * N, C).astype(jnp.bfloat16)

        # one fused qkv matmul; q/k/v are lane-aligned static slices (C % 128 == 0)
        qkv = jnp.dot(xnf, wqkv_ref[0], preferred_element_type=jnp.float32)
        q = qkv[:, 0 * C:1 * C].astype(jnp.bfloat16).reshape(TB, N, C)
        k = qkv[:, 1 * C:2 * C].astype(jnp.bfloat16).reshape(TB, N, C)
        v = qkv[:, 2 * C:3 * C].astype(jnp.bfloat16).reshape(TB, N, C)

        # per-head score / softmax / AV with bf16 MXU operands, f32 accumulation;
        # each head's output goes straight into a lane-aligned scratch slice.
        for h in range(num_heads):                         # small static unroll
            lo = h * Dh
            qh = q[:, :, lo:lo + Dh]
            kh = k[:, :, lo:lo + Dh]
            vh = v[:, :, lo:lo + Dh]
            s = jnp.einsum("bqd,bkd->bqk", qh, kh,
                           preferred_element_type=jnp.float32) * scale
            s = s - jnp.max(s, axis=-1, keepdims=True)
            p = jnp.exp(s)
            # reciprocal on the EUP slot instead of a VALU divide
            p = p * pl.reciprocal(jnp.sum(p, axis=-1, keepdims=True), approx=True)
            oh = jnp.einsum("bqk,bkd->bqd", p.astype(jnp.bfloat16), vh,
                            preferred_element_type=jnp.float32)
            attn_sc[:, :, lo:lo + Dh] = oh.astype(jnp.bfloat16)

        # single K=C output projection over the concatenated heads
        proj = jnp.dot(attn_sc[...].reshape(TB * N, C), wproj_ref[0],
                       preferred_element_type=jnp.float32)
        x_attn = x + proj.reshape(TB, N, C)

        out_ref[...] = x_attn                              # carry = post-attn residual
        xn2_sc[...] = _rms_norm(x_attn, g2_ref[0], eps).astype(jnp.bfloat16)
        acc_sc[...] = jnp.zeros_like(acc_sc)

    # ---- SwiGLU FFN chunk f_idx: acc += silu(x@fc1)*(x@fc3) @ fc2 ----------
    xf2 = xn2_sc[...].reshape(TB * N, C)                   # bf16
    hg = jnp.dot(xf2, wfc13_ref[0, 0], preferred_element_type=jnp.float32)
    h1 = hg[:, :Ft]
    h3 = hg[:, Ft:]
    hidden = (h1 * jax.nn.sigmoid(h1)) * h3                # silu(fc1) * fc3, f32
    acc_sc[...] += jnp.dot(hidden.astype(jnp.bfloat16), wfc2_ref[0, 0],
                           preferred_element_type=jnp.float32).reshape(TB, N, C)

    # ---- finalize layer / final post_trunk_norm ----------------------------
    @pl.when((f_idx == n_f - 1) & (layer < n_layers - 1))
    def _():
        out_ref[...] = out_ref[...] + acc_sc[...]

    @pl.when((f_idx == n_f - 1) & (layer == n_layers - 1))
    def _():
        out_ref[...] = _rms_norm(out_ref[...] + acc_sc[...], gpost_ref[...], eps)


# ----------------------------- wrapper ------------------------------------ #
def transformer_forward(x, params, *, num_heads, eps, batch_tile=None,
                        ffn_chunks=1, vmem_limit_bytes=None):
    """params hold canonical [in, out] weights:
       w_qkv (L,C,3C), w_proj (L,C,C), w_fc1/w_fc3 (L,C,F), w_fc2 (L,F,C) in bf16,
       g1/g2 (L,1,C), g_post (1,C) in f32.
       batch_tile: None -> B (weights stream once; best for v5e). For v7x pick B//2.
       ffn_chunks: tile the SwiGLU F dimension (use >1 on v7x at real model sizes)."""
    B, N, C = x.shape
    w_qkv, w_proj = params["w_qkv"], params["w_proj"]
    w_fc1, w_fc3, w_fc2 = params["w_fc1"], params["w_fc3"], params["w_fc2"]
    g1, g2, g_post = params["g1"], params["g2"], params["g_post"]

    L = w_qkv.shape[0]
    F = w_fc1.shape[-1]
    TB = B if batch_tile is None else batch_tile
    NF = ffn_chunks
    assert B % TB == 0, "batch_tile must divide B"
    assert F % NF == 0, "ffn_chunks must divide intermediate_size"
    assert C % num_heads == 0
    Ft = F // NF
    # Best performance when C, Ft (and ideally N) are multiples of 128 (lane-dense
    # vregs, free static slices); the kernel is still correct otherwise.

    # fc1|fc3 fused per F-chunk: (L, NF, C, 2*Ft), columns = [fc1 chunk | fc3 chunk]
    w_fc13 = jnp.concatenate(
        [w_fc1.reshape(L, C, NF, Ft), w_fc3.reshape(L, C, NF, Ft)], axis=-1)
    w_fc13 = jnp.transpose(w_fc13, (0, 2, 1, 3))           # (L, NF, C, 2*Ft)
    w_fc2c = w_fc2.reshape(L, NF, Ft, C)                   # (L, NF, Ft, C)

    if vmem_limit_bytes is None:
        # Use most of the physical VMEM (128 MiB on v5e/v6e, 64 MiB on v7x),
        # instead of the conservative scoped default.
        try:
            cap = int(pltpu.get_tpu_info().vmem_capacity_bytes)
            vmem_limit_bytes = max(32 << 20, min(int(0.85 * cap), 112 << 20))
        except Exception:
            vmem_limit_bytes = 64 << 20

    kernel = functools.partial(transformer_kernel, num_heads=num_heads, eps=eps)

    # Advisory cost estimate (helps XLA overlap surrounding ops).
    flops = 2 * L * B * N * (4 * C * C + 3 * C * F + 2 * N * C)
    cost = pl.CostEstimate(
        flops=int(flops),
        transcendentals=int(L * B * N * (num_heads * N + F)),
        bytes_accessed=int((B // TB) * 2 * L * (4 * C * C + 3 * C * F)
                           + 2 * 4 * B * N * C),
    )

    grid_spec = pltpu.PrefetchScalarGridSpec(
        num_scalar_prefetch=0,
        grid=(B // TB, L, NF),                              # (batch tile, layer, F chunk)
        in_specs=[
            pl.BlockSpec(memory_space=pl.ANY),                            # tokens (HBM)
            pl.BlockSpec((1, C, 3 * C), lambda b, l, f: (l, 0, 0)),       # w_qkv
            pl.BlockSpec((1, C, C), lambda b, l, f: (l, 0, 0)),           # w_proj
            pl.BlockSpec((1, 1, C, 2 * Ft), lambda b, l, f: (l, f, 0, 0)),  # w_fc1|fc3
            pl.BlockSpec((1, 1, Ft, C), lambda b, l, f: (l, f, 0, 0)),    # w_fc2
            pl.BlockSpec((1, 1, C), lambda b, l, f: (l, 0, 0)),           # norm_1 w
            pl.BlockSpec((1, 1, C), lambda b, l, f: (l, 0, 0)),           # norm_2 w
            pl.BlockSpec((1, C), lambda b, l, f: (0, 0)),                 # post norm w
        ],
        out_specs=pl.BlockSpec((TB, N, C), lambda b, l, f: (b, 0, 0)),
        scratch_shapes=[
            pltpu.VMEM((TB, N, C), jnp.bfloat16),      # attention head outputs
            pltpu.VMEM((TB, N, C), jnp.bfloat16),      # norm_2(x) reused across F chunks
            pltpu.VMEM((TB, N, C), jnp.float32),       # FFN accumulator
            pltpu.SemaphoreType.DMA(()),               # token seed DMA
        ],
    )

    return pl.pallas_call(
        kernel,
        out_shape=jax.ShapeDtypeStruct((B, N, C), jnp.float32),
        grid_spec=grid_spec,
        compiler_params=pltpu.CompilerParams(
            # batch tiles are independent (megacore / v7x 2-TC friendly);
            # layer and F-chunk axes are sequential carries.
            dimension_semantics=("parallel", "arbitrary", "arbitrary"),
            vmem_limit_bytes=vmem_limit_bytes,
        ),
        cost_estimate=cost,
    )(x, w_qkv, w_proj, w_fc13, w_fc2c, g1, g2, g_post)


# --------------------------- pure-JAX reference ---------------------------- #
def _rms_norm_ref(x, g, eps):
    xf = x.astype(jnp.float32)
    ms = jnp.mean(xf * xf, axis=-1, keepdims=True)
    return xf * jax.lax.rsqrt(ms + eps) * g


def _mm(a, w):
    # Mirror the kernel's mixed precision: bf16 operands, f32 accumulation.
    return jnp.dot(a.astype(jnp.bfloat16), w, preferred_element_type=jnp.float32)


def transformer_ref(x, params, *, num_heads, eps):
    L = params["w_qkv"].shape[0]
    B, N, C = x.shape
    Dh = C // num_heads
    scale = 1.0 / (Dh ** 0.5)
    x = x.astype(jnp.float32)
    for l in range(L):
        xn = _rms_norm_ref(x, params["g1"][l, 0], eps)
        qkv = _mm(xn, params["w_qkv"][l])                    # (B, N, 3C) f32
        q, k, v = jnp.split(qkv, 3, axis=-1)
        # mirror the kernel's bf16 attention operands (f32 accumulation)
        q = q.astype(jnp.bfloat16).reshape(B, N, num_heads, Dh).transpose(0, 2, 1, 3)
        k = k.astype(jnp.bfloat16).reshape(B, N, num_heads, Dh).transpose(0, 2, 1, 3)
        v = v.astype(jnp.bfloat16).reshape(B, N, num_heads, Dh).transpose(0, 2, 1, 3)
        s = jnp.einsum("bhqd,bhkd->bhqk", q, k,
                       preferred_element_type=jnp.float32) * scale
        p = jax.nn.softmax(s, axis=-1)
        o = jnp.einsum("bhqk,bhkd->bhqd", p.astype(jnp.bfloat16), v,
                       preferred_element_type=jnp.float32)
        o = o.transpose(0, 2, 1, 3).reshape(B, N, C)
        x = x + _mm(o, params["w_proj"][l])
        xn2 = _rms_norm_ref(x, params["g2"][l, 0], eps)
        h1 = _mm(xn2, params["w_fc1"][l])
        h3 = _mm(xn2, params["w_fc3"][l])
        hidden = jax.nn.silu(h1) * h3
        x = x + _mm(hidden, params["w_fc2"][l])
    return _rms_norm_ref(x, params["g_post"][0], eps)


# ------------------------------- main -------------------------------------- #
if __name__ == "__main__":
    # Config (aimv2-style, small but lane-aligned): qkv_bias=False, use_bias=False.
    B, N = 2, 16                # batch, sequence length (tokens)
    C = 256                     # hidden_size (multiple of 128 -> lane dense)
    F = 512                     # intermediate_size
    H = 2                       # num_attention_heads -> head_dim = 128 (as in AIMv2-large)
    L = 2                       # num_hidden_layers
    EPS = 1e-5                  # rms_norm_eps

    key = jax.random.PRNGKey(0)
    ks = jax.random.split(key, 9)

    def init(k, shape, scale=0.02):
        return scale * jax.random.normal(k, shape, dtype=jnp.float32)

    # Canonical [in, out] weights, quantized once to bf16 (weight-streaming win).
    w_qkv = init(ks[0], (L, C, 3 * C)).astype(jnp.bfloat16)   # out cols = [q|k|v]
    w_proj = init(ks[1], (L, C, C)).astype(jnp.bfloat16)
    w_fc1 = init(ks[2], (L, C, F)).astype(jnp.bfloat16)
    w_fc3 = init(ks[3], (L, C, F)).astype(jnp.bfloat16)
    w_fc2 = init(ks[4], (L, F, C)).astype(jnp.bfloat16)
    # RMSNorm weights: torch init is ones; perturb slightly so scaling is exercised.
    g1 = (1.0 + 0.01 * jax.random.normal(ks[5], (L, 1, C))).astype(jnp.float32)
    g2 = (1.0 + 0.01 * jax.random.normal(ks[6], (L, 1, C))).astype(jnp.float32)
    g_post = (1.0 + 0.01 * jax.random.normal(ks[7], (1, C))).astype(jnp.float32)
    x = jax.random.normal(ks[8], (B, N, C), dtype=jnp.float32)

    params = {
        "w_qkv": w_qkv, "w_proj": w_proj, "w_fc1": w_fc1, "w_fc3": w_fc3,
        "w_fc2": w_fc2, "g1": g1, "g2": g2, "g_post": g_post,
    }

    # batch_tile=None -> single batch tile (weights stream once);
    # ffn_chunks=2 exercises the F-tiled SwiGLU path (v7x VMEM budget).
    out = transformer_forward(x, params, num_heads=H, eps=EPS,
                              batch_tile=None, ffn_chunks=2)
    out = jax.block_until_ready(out)

    ref = transformer_ref(x, params, num_heads=H, eps=EPS)
    assert out.shape == (B, N, C)
    err = float(jnp.max(jnp.abs(out - ref)))
    assert jnp.allclose(out, ref, rtol=2e-3, atol=2e-3), f"max abs err = {err}"

    print("KERNEL_OK")
</pallas_src>

<mosaic_0001>
module attributes {stable_mosaic.version = 11 : i64} {
  func.func @transformer_kernel(%arg0: i32, %arg1: i32, %arg2: i32, %arg3: memref<2x16x256xf32, #tpu.memory_space<any>>, %arg4: memref<1x256x768xbf16, #tpu.memory_space<vmem>>, %arg5: memref<1x256x256xbf16, #tpu.memory_space<vmem>>, %arg6: memref<1x1x256x512xbf16, #tpu.memory_space<vmem>>, %arg7: memref<1x1x256x256xbf16, #tpu.memory_space<vmem>>, %arg8: memref<1x1x256xf32, #tpu.memory_space<vmem>>, %arg9: memref<1x1x256xf32, #tpu.memory_space<vmem>>, %arg10: memref<1x256xf32, #tpu.memory_space<vmem>>, %arg11: memref<2x16x256xf32, #tpu.memory_space<vmem>>, %arg12: memref<2x16x256xbf16, #tpu.memory_space<vmem>>, %arg13: memref<2x16x256xbf16, #tpu.memory_space<vmem>>, %arg14: memref<2x16x256xf32, #tpu.memory_space<vmem>>, %arg15: memref<!tpu.dma_semaphore, #tpu.memory_space<semaphore_mem>>) attributes {dimension_semantics = [#tpu.dimension_semantics<parallel>, #tpu.dimension_semantics<arbitrary>, #tpu.dimension_semantics<arbitrary>], iteration_bounds = array<i64: 1, 2, 2>, scalar_prefetch = 0 : i64, scratch_operands = 4 : i64, tpu.core_type = #tpu.core_type<tc>, window_params = [{}, {transform_indices = @transform_1, window_bounds = array<i64: 1, 256, 768>}, {transform_indices = @transform_2, window_bounds = array<i64: 1, 256, 256>}, {transform_indices = @transform_3, window_bounds = array<i64: 1, 1, 256, 512>}, {transform_indices = @transform_4, window_bounds = array<i64: 1, 1, 256, 256>}, {transform_indices = @transform_5, window_bounds = array<i64: 1, 1, 256>}, {transform_indices = @transform_6, window_bounds = array<i64: 1, 1, 256>}, {pipeline_mode = #tpu.pipeline_mode<synchronous>, transform_indices = @transform_7, window_bounds = array<i64: 1, 256>}, {transform_indices = @transform_8, window_bounds = array<i64: 2, 16, 256>}]} {
    %c0_i32 = arith.constant 0 : i32
    %0 = arith.cmpi eq, %arg1, %c0_i32 : i32
    %c0_i32_0 = arith.constant 0 : i32
    %1 = arith.cmpi eq, %arg2, %c0_i32_0 : i32
    %2 = arith.andi %0, %1 : i1
    %3 = arith.extui %2 : i1 to i32
    %c0_i32_1 = arith.constant 0 : i32
    %4 = arith.cmpi ne, %3, %c0_i32_1 : i32
    scf.if %4 {
      %c2_i32 = arith.constant 2 : i32
      %40 = arith.muli %arg0, %c2_i32 : i32
      %c0_i32_27 = arith.constant 0 : i32
      %c0_i32_28 = arith.constant 0 : i32
      %41 = tpu.memref_slice %arg3[%40, %c0_i32_27, %c0_i32_28] : memref<2x16x256xf32, #tpu.memory_space<any>> -> memref<2x16x256xf32, #tpu.memory_space<any>>
      tpu.enqueue_dma source(%41 : memref<2x16x256xf32, #tpu.memory_space<any>>) target(%arg11 : memref<2x16x256xf32, #tpu.memory_space<vmem>>) target_semaphore(%arg15 : memref<!tpu.dma_semaphore, #tpu.memory_space<semaphore_mem>>)
      %c0_i32_29 = arith.constant 0 : i32
      %c0_i32_30 = arith.constant 0 : i32
      %42 = tpu.memref_slice %arg3[%40, %c0_i32_29, %c0_i32_30] : memref<2x16x256xf32, #tpu.memory_space<any>> -> memref<2x16x256xf32, #tpu.memory_space<any>>
      tpu.wait_dma2 semaphore(%arg15 : memref<!tpu.dma_semaphore, #tpu.memory_space<semaphore_mem>>) src(%42 : memref<2x16x256xf32, #tpu.memory_space<any>>) dst(%arg11 : memref<2x16x256xf32, #tpu.memory_space<vmem>>)
    } else {
    }
    %c0_i32_2 = arith.constant 0 : i32
    %5 = arith.cmpi eq, %arg2, %c0_i32_2 : i32
    %6 = arith.extui %5 : i1 to i32
    %c0_i32_3 = arith.constant 0 : i32
    %7 = arith.cmpi ne, %6, %c0_i32_3 : i32
    scf.if %7 {
      %c0_27 = arith.constant 0 : index
      %c0_28 = arith.constant 0 : index
      %c0_29 = arith.constant 0 : index
      %40 = vector.load %arg11[%c0_27, %c0_28, %c0_29] : memref<2x16x256xf32, #tpu.memory_space<vmem>>, vector<2x16x256xf32>
      %c0_30 = arith.constant 0 : index
      %c0_31 = arith.constant 0 : index
      %c0_32 = arith.constant 0 : index
      %41 = vector.load %arg8[%c0_30, %c0_31, %c0_32] : memref<1x1x256xf32, #tpu.memory_space<vmem>>, vector<1x1x256xf32>
      %42 = vector.shape_cast %41 : vector<1x1x256xf32> to vector<1x256xf32>
      %43 = arith.mulf %40, %40 : vector<2x16x256xf32>
      %cst_33 = arith.constant dense<0.000000e+00> : vector<2x16xf32>
      %44 = vector.multi_reduction <add>, %43, %cst_33 [2] : vector<2x16x256xf32> to vector<2x16xf32>
      %45 = vector.shape_cast %44 : vector<2x16xf32> to vector<2x16x1xf32>
      %cst_34 = arith.constant 2.560000e+02 : f32
      %46 = vector.broadcast %cst_34 : f32 to vector<2x16x1xf32>
      %47 = arith.divf %45, %46 : vector<2x16x1xf32>
      %cst_35 = arith.constant 9.99999974E-6 : f32
      %48 = vector.broadcast %cst_35 : f32 to vector<2x16x1xf32>
      %49 = arith.addf %47, %48 : vector<2x16x1xf32>
      %50 = math.rsqrt %49 : vector<2x16x1xf32>
      %51 = vector.broadcast %50 : vector<2x16x1xf32> to vector<2x16x256xf32>
      %52 = arith.mulf %40, %51 : vector<2x16x256xf32>
      %53 = vector.shape_cast %42 : vector<1x256xf32> to vector<1x1x256xf32>
      %54 = vector.broadcast %53 : vector<1x1x256xf32> to vector<2x16x256xf32>
      %55 = arith.mulf %52, %54 : vector<2x16x256xf32>
      %56 = vector.shape_cast %55 : vector<2x16x256xf32> to vector<32x256xf32>
      %57 = arith.truncf %56 : vector<32x256xf32> to vector<32x256xbf16>
      %c0_36 = arith.constant 0 : index
      %c0_37 = arith.constant 0 : index
      %c0_38 = arith.constant 0 : index
      %58 = vector.load %arg4[%c0_36, %c0_37, %c0_38] : memref<1x256x768xbf16, #tpu.memory_space<vmem>>, vector<1x256x768xbf16>
      %59 = vector.shape_cast %58 : vector<1x256x768xbf16> to vector<256x768xbf16>
      %cst_39 = arith.constant dense<0.000000e+00> : vector<32x768xf32>
      %60 = tpu.matmul %57, %59, %cst_39 {dimension_numbers = #tpu.dot_dimension_numbers<[1], [0], [0], [1], [0, 0, 1, 1], [], []>} : vector<32x256xbf16>, vector<256x768xbf16>, vector<32x768xf32> -> vector<32x768xf32>
      %61 = vector.extract_strided_slice %60 {offsets = [0, 0], sizes = [32, 256], strides = [1, 1]} : vector<32x768xf32> to vector<32x256xf32>
      %62 = arith.truncf %61 : vector<32x256xf32> to vector<32x256xbf16>
      %63 = vector.shape_cast %62 : vector<32x256xbf16> to vector<2x16x256xbf16>
      %64 = vector.extract_strided_slice %60 {offsets = [0, 256], sizes = [32, 256], strides = [1, 1]} : vector<32x768xf32> to vector<32x256xf32>
      %65 = arith.truncf %64 : vector<32x256xf32> to vector<32x256xbf16>
      %66 = vector.shape_cast %65 : vector<32x256xbf16> to vector<2x16x256xbf16>
      %67 = vector.extract_strided_slice %60 {offsets = [0, 512], sizes = [32, 256], strides = [1, 1]} : vector<32x768xf32> to vector<32x256xf32>
      %68 = arith.truncf %67 : vector<32x256xf32> to vector<32x256xbf16>
      %69 = vector.shape_cast %68 : vector<32x256xbf16> to vector<2x16x256xbf16>
      %70 = vector.extract_strided_slice %63 {offsets = [0, 0, 0], sizes = [2, 16, 128], strides = [1, 1, 1]} : vector<2x16x256xbf16> to vector<2x16x128xbf16>
      %71 = vector.extract_strided_slice %66 {offsets = [0, 0, 0], sizes = [2, 16, 128], strides = [1, 1, 1]} : vector<2x16x256xbf16> to vector<2x16x128xbf16>
      %72 = vector.extract_strided_slice %69 {offsets = [0, 0, 0], sizes = [2, 16, 128], strides = [1, 1, 1]} : vector<2x16x256xbf16> to vector<2x16x128xbf16>
      "tpu.trace_start"() <{level = 10 : i32, message = "bqd,bkd->bqk"}> : () -> ()
      %cst_40 = arith.constant dense<0.000000e+00> : vector<2x16x16xf32>
      %73 = tpu.matmul %70, %71, %cst_40 {dimension_numbers = #tpu.dot_dimension_numbers<[2], [2], [1], [1], [0, 0, 0, 1, 1, 1], [0], [0]>} : vector<2x16x128xbf16>, vector<2x16x128xbf16>, vector<2x16x16xf32> -> vector<2x16x16xf32>
      "tpu.trace_stop"() : () -> ()
      %cst_41 = arith.constant 0.0883883461 : f32
      %74 = vector.broadcast %cst_41 : f32 to vector<2x16x16xf32>
      %75 = arith.mulf %73, %74 : vector<2x16x16xf32>
      %cst_42 = arith.constant dense<0xFF800000> : vector<2x16xf32>
      %76 = vector.multi_reduction <maximumf>, %75, %cst_42 [2] : vector<2x16x16xf32> to vector<2x16xf32>
      %77 = vector.shape_cast %76 : vector<2x16xf32> to vector<2x16x1xf32>
      %78 = vector.broadcast %77 : vector<2x16x1xf32> to vector<2x16x16xf32>
      %79 = arith.subf %75, %78 : vector<2x16x16xf32>
      %80 = math.exp %79 : vector<2x16x16xf32>
      %cst_43 = arith.constant dense<0.000000e+00> : vector<2x16xf32>
      %81 = vector.multi_reduction <add>, %80, %cst_43 [2] : vector<2x16x16xf32> to vector<2x16xf32>
      %82 = vector.shape_cast %81 : vector<2x16xf32> to vector<2x16x1xf32>
      %83 = tpu.reciprocal %82 {approx = true} : vector<2x16x1xf32> -> vector<2x16x1xf32>
      %84 = vector.broadcast %83 : vector<2x16x1xf32> to vector<2x16x16xf32>
      %85 = arith.mulf %80, %84 : vector<2x16x16xf32>
      %86 = arith.truncf %85 : vector<2x16x16xf32> to vector<2x16x16xbf16>
      "tpu.trace_start"() <{level = 10 : i32, message = "bqk,bkd->bqd"}> : () -> ()
      %cst_44 = arith.constant dense<0.000000e+00> : vector<2x16x128xf32>
      %87 = tpu.matmul %86, %72, %cst_44 {dimension_numbers = #tpu.dot_dimension_numbers<[2], [1], [1], [2], [0, 0, 0, 1, 1, 2], [0], [0]>} : vector<2x16x16xbf16>, vector<2x16x128xbf16>, vector<2x16x128xf32> -> vector<2x16x128xf32>
      "tpu.trace_stop"() : () -> ()
      %88 = arith.truncf %87 : vector<2x16x128xf32> to vector<2x16x128xbf16>
      %c0_45 = arith.constant 0 : index
      %c0_46 = arith.constant 0 : index
      %c0_47 = arith.constant 0 : index
      %89 = vector.load %arg12[%c0_45, %c0_46, %c0_47] : memref<2x16x256xbf16, #tpu.memory_space<vmem>>, vector<2x16x128xbf16>
      tpu.vector_store %arg12[%c0_45, %c0_46, %c0_47], %88 {strides = array<i32>} : memref<2x16x256xbf16, #tpu.memory_space<vmem>>, vector<2x16x128xbf16>,
      %90 = vector.extract_strided_slice %63 {offsets = [0, 0, 128], sizes = [2, 16, 128], strides = [1, 1, 1]} : vector<2x16x256xbf16> to vector<2x16x128xbf16>
      %91 = vector.extract_strided_slice %66 {offsets = [0, 0, 128], sizes = [2, 16, 128], strides = [1, 1, 1]} : vector<2x16x256xbf16> to vector<2x16x128xbf16>
      %92 = vector.extract_strided_slice %69 {offsets = [0, 0, 128], sizes = [2, 16, 128], strides = [1, 1, 1]} : vector<2x16x256xbf16> to vector<2x16x128xbf16>
      "tpu.trace_start"() <{level = 10 : i32, message = "bqd,bkd->bqk"}> : () -> ()
      %cst_48 = arith.constant dense<0.000000e+00> : vector<2x16x16xf32>
      %93 = tpu.matmul %90, %91, %cst_48 {dimension_numbers = #tpu.dot_dimension_numbers<[2], [2], [1], [1], [0, 0, 0, 1, 1, 1], [0], [0]>} : vector<2x16x128xbf16>, vector<2x16x128xbf16>, vector<2x16x16xf32> -> vector<2x16x16xf32>
      "tpu.trace_stop"() : () -> ()
      %cst_49 = arith.constant 0.0883883461 : f32
      %94 = vector.broadcast %cst_49 : f32 to vector<2x16x16xf32>
      %95 = arith.mulf %93, %94 : vector<2x16x16xf32>
      %cst_50 = arith.constant dense<0xFF800000> : vector<2x16xf32>
      %96 = vector.multi_reduction <maximumf>, %95, %cst_50 [2] : vector<2x16x16xf32> to vector<2x16xf32>
      %97 = vector.shape_cast %96 : vector<2x16xf32> to vector<2x16x1xf32>
      %98 = vector.broadcast %97 : vector<2x16x1xf32> to vector<2x16x16xf32>
      %99 = arith.subf %95, %98 : vector<2x16x16xf32>
      %100 = math.exp %99 : vector<2x16x16xf32>
      %cst_51 = arith.constant dense<0.000000e+00> : vector<2x16xf32>
      %101 = vector.multi_reduction <add>, %100, %cst_51 [2] : vector<2x16x16xf32> to vector<2x16xf32>
      %102 = vector.shape_cast %101 : vector<2x16xf32> to vector<2x16x1xf32>
      %103 = tpu.reciprocal %102 {approx = true} : vector<2x16x1xf32> -> vector<2x16x1xf32>
      %104 = vector.broadcast %103 : vector<2x16x1xf32> to vector<2x16x16xf32>
      %105 = arith.mulf %100, %104 : vector<2x16x16xf32>
      %106 = arith.truncf %105 : vector<2x16x16xf32> to vector<2x16x16xbf16>
      "tpu.trace_start"() <{level = 10 : i32, message = "bqk,bkd->bqd"}> : () -> ()
      %cst_52 = arith.constant dense<0.000000e+00> : vector<2x16x128xf32>
      %107 = tpu.matmul %106, %92, %cst_52 {dimension_numbers = #tpu.dot_dimension_numbers<[2], [1], [1], [2], [0, 0, 0, 1, 1, 2], [0], [0]>} : vector<2x16x16xbf16>, vector<2x16x128xbf16>, vector<2x16x128xf32> -> vector<2x16x128xf32>
      "tpu.trace_stop"() : () -> ()
      %108 = arith.truncf %107 : vector<2x16x128xf32> to vector<2x16x128xbf16>
      %c0_53 = arith.constant 0 : index
      %c0_54 = arith.constant 0 : index
      %c128 = arith.constant 128 : index
      %109 = vector.load %arg12[%c0_53, %c0_54, %c128] : memref<2x16x256xbf16, #tpu.memory_space<vmem>>, vector<2x16x128xbf16>
      tpu.vector_store %arg12[%c0_53, %c0_54, %c128], %108 {strides = array<i32>} : memref<2x16x256xbf16, #tpu.memory_space<vmem>>, vector<2x16x128xbf16>,
      %c0_55 = arith.constant 0 : index
      %c0_56 = arith.constant 0 : index
      %c0_57 = arith.constant 0 : index
      %110 = vector.load %arg12[%c0_55, %c0_56, %c0_57] : memref<2x16x256xbf16, #tpu.memory_space<vmem>>, vector<2x16x256xbf16>
      %111 = vector.shape_cast %110 : vector<2x16x256xbf16> to vector<32x256xbf16>
      %c0_58 = arith.constant 0 : index
      %c0_59 = arith.constant 0 : index
      %c0_60 = arith.constant 0 : index
      %112 = vector.load %arg5[%c0_58, %c0_59, %c0_60] : memref<1x256x256xbf16, #tpu.memory_space<vmem>>, vector<1x256x256xbf16>
      %113 = vector.shape_cast %112 : vector<1x256x256xbf16> to vector<256x256xbf16>
      %cst_61 = arith.constant dense<0.000000e+00> : vector<32x256xf32>
      %114 = tpu.matmul %111, %113, %cst_61 {dimension_numbers = #tpu.dot_dimension_numbers<[1], [0], [0], [1], [0, 0, 1, 1], [], []>} : vector<32x256xbf16>, vector<256x256xbf16>, vector<32x256xf32> -> vector<32x256xf32>
      %115 = vector.shape_cast %114 : vector<32x256xf32> to vector<2x16x256xf32>
      %116 = arith.addf %40, %115 : vector<2x16x256xf32>
      %c0_62 = arith.constant 0 : index
      %c0_63 = arith.constant 0 : index
      %c0_64 = arith.constant 0 : index
      %117 = vector.load %arg11[%c0_62, %c0_63, %c0_64] : memref<2x16x256xf32, #tpu.memory_space<vmem>>, vector<2x16x256xf32>
      tpu.vector_store %arg11[%c0_62, %c0_63, %c0_64], %116 {strides = array<i32>} : memref<2x16x256xf32, #tpu.memory_space<vmem>>, vector<2x16x256xf32>,
      %c0_65 = arith.constant 0 : index
      %c0_66 = arith.constant 0 : index
      %c0_67 = arith.constant 0 : index
      %118 = vector.load %arg9[%c0_65, %c0_66, %c0_67] : memref<1x1x256xf32, #tpu.memory_space<vmem>>, vector<1x1x256xf32>
      %119 = vector.shape_cast %118 : vector<1x1x256xf32> to vector<1x256xf32>
      %120 = arith.mulf %116, %116 : vector<2x16x256xf32>
      %cst_68 = arith.constant dense<0.000000e+00> : vector<2x16xf32>
      %121 = vector.multi_reduction <add>, %120, %cst_68 [2] : vector<2x16x256xf32> to vector<2x16xf32>
      %122 = vector.shape_cast %121 : vector<2x16xf32> to vector<2x16x1xf32>
      %cst_69 = arith.constant 2.560000e+02 : f32
      %123 = vector.broadcast %cst_69 : f32 to vector<2x16x1xf32>
      %124 = arith.divf %122, %123 : vector<2x16x1xf32>
      %cst_70 = arith.constant 9.99999974E-6 : f32
      %125 = vector.broadcast %cst_70 : f32 to vector<2x16x1xf32>
      %126 = arith.addf %124, %125 : vector<2x16x1xf32>
      %127 = math.rsqrt %126 : vector<2x16x1xf32>
      %128 = vector.broadcast %127 : vector<2x16x1xf32> to vector<2x16x256xf32>
      %129 = arith.mulf %116, %128 : vector<2x16x256xf32>
      %130 = vector.shape_cast %119 : vector<1x256xf32> to vector<1x1x256xf32>
      %131 = vector.broadcast %130 : vector<1x1x256xf32> to vector<2x16x256xf32>
      %132 = arith.mulf %129, %131 : vector<2x16x256xf32>
      %133 = arith.truncf %132 : vector<2x16x256xf32> to vector<2x16x256xbf16>
      %c0_71 = arith.constant 0 : index
      %c0_72 = arith.constant 0 : index
      %c0_73 = arith.constant 0 : index
      %134 = vector.load %arg13[%c0_71, %c0_72, %c0_73] : memref<2x16x256xbf16, #tpu.memory_space<vmem>>, vector<2x16x256xbf16>
      tpu.vector_store %arg13[%c0_71, %c0_72, %c0_73], %133 {strides = array<i32>} : memref<2x16x256xbf16, #tpu.memory_space<vmem>>, vector<2x16x256xbf16>,
      %cst_74 = arith.constant 0.000000e+00 : f32
      %135 = vector.broadcast %cst_74 : f32 to vector<2x16x256xf32>
      %c0_75 = arith.constant 0 : index
      %c0_76 = arith.constant 0 : index
      %c0_77 = arith.constant 0 : index
      %136 = vector.load %arg14[%c0_75, %c0_76, %c0_77] : memref<2x16x256xf32, #tpu.memory_space<vmem>>, vector<2x16x256xf32>
      tpu.vector_store %arg14[%c0_75, %c0_76, %c0_77], %135 {strides = array<i32>} : memref<2x16x256xf32, #tpu.memory_space<vmem>>, vector<2x16x256xf32>,
    } else {
    }
    %c0 = arith.constant 0 : index
    %c0_4 = arith.constant 0 : index
    %c0_5 = arith.constant 0 : index
    %8 = vector.load %arg13[%c0, %c0_4, %c0_5] : memref<2x16x256xbf16, #tpu.memory_space<vmem>>, vector<2x16x256xbf16>
    %9 = vector.shape_cast %8 : vector<2x16x256xbf16> to vector<32x256xbf16>
    %c0_6 = arith.constant 0 : index
    %c0_7 = arith.constant 0 : index
    %c0_8 = arith.constant 0 : index
    %c0_9 = arith.constant 0 : index
    %10 = vector.load %arg6[%c0_6, %c0_7, %c0_8, %c0_9] : memref<1x1x256x512xbf16, #tpu.memory_space<vmem>>, vector<1x1x256x512xbf16>
    %11 = vector.shape_cast %10 : vector<1x1x256x512xbf16> to vector<256x512xbf16>
    %cst = arith.constant dense<0.000000e+00> : vector<32x512xf32>
    %12 = tpu.matmul %9, %11, %cst {dimension_numbers = #tpu.dot_dimension_numbers<[1], [0], [0], [1], [0, 0, 1, 1], [], []>} : vector<32x256xbf16>, vector<256x512xbf16>, vector<32x512xf32> -> vector<32x512xf32>
    %13 = vector.extract_strided_slice %12 {offsets = [0, 0], sizes = [32, 256], strides = [1, 1]} : vector<32x512xf32> to vector<32x256xf32>
    %14 = vector.extract_strided_slice %12 {offsets = [0, 256], sizes = [32, 256], strides = [1, 1]} : vector<32x512xf32> to vector<32x256xf32>
    %15 = arith.negf %13 : vector<32x256xf32>
    %16 = math.exp %15 : vector<32x256xf32>
    %cst_10 = arith.constant 1.000000e+00 : f32
    %17 = vector.broadcast %cst_10 : f32 to vector<32x256xf32>
    %18 = arith.addf %17, %16 : vector<32x256xf32>
    %19 = arith.divf %17, %18 : vector<32x256xf32>
    %20 = arith.mulf %13, %19 : vector<32x256xf32>
    %21 = arith.mulf %20, %14 : vector<32x256xf32>
    %c0_11 = arith.constant 0 : index
    %c0_12 = arith.constant 0 : index
    %c0_13 = arith.constant 0 : index
    %22 = vector.load %arg14[%c0_11, %c0_12, %c0_13] : memref<2x16x256xf32, #tpu.memory_space<vmem>>, vector<2x16x256xf32>
    %23 = arith.truncf %21 : vector<32x256xf32> to vector<32x256xbf16>
    %c0_14 = arith.constant 0 : index
    %c0_15 = arith.constant 0 : index
    %c0_16 = arith.constant 0 : index
    %c0_17 = arith.constant 0 : index
    %24 = vector.load %arg7[%c0_14, %c0_15, %c0_16, %c0_17] : memref<1x1x256x256xbf16, #tpu.memory_space<vmem>>, vector<1x1x256x256xbf16>
    %25 = vector.shape_cast %24 : vector<1x1x256x256xbf16> to vector<256x256xbf16>
    %cst_18 = arith.constant dense<0.000000e+00> : vector<32x256xf32>
    %26 = tpu.matmul %23, %25, %cst_18 {dimension_numbers = #tpu.dot_dimension_numbers<[1], [0], [0], [1], [0, 0, 1, 1], [], []>} : vector<32x256xbf16>, vector<256x256xbf16>, vector<32x256xf32> -> vector<32x256xf32>
    %27 = vector.shape_cast %26 : vector<32x256xf32> to vector<2x16x256xf32>
    %28 = arith.addf %22, %27 : vector<2x16x256xf32>
    %c0_19 = arith.constant 0 : index
    %c0_20 = arith.constant 0 : index
    %c0_21 = arith.constant 0 : index
    %29 = vector.load %arg14[%c0_19, %c0_20, %c0_21] : memref<2x16x256xf32, #tpu.memory_space<vmem>>, vector<2x16x256xf32>
    tpu.vector_store %arg14[%c0_19, %c0_20, %c0_21], %28 {strides = array<i32>} : memref<2x16x256xf32, #tpu.memory_space<vmem>>, vector<2x16x256xf32>,
    %c1_i32 = arith.constant 1 : i32
    %30 = arith.cmpi eq, %arg2, %c1_i32 : i32
    %c1_i32_22 = arith.constant 1 : i32
    %31 = arith.cmpi slt, %arg1, %c1_i32_22 : i32
    %32 = arith.andi %30, %31 : i1
    %33 = arith.extui %32 : i1 to i32
    %c0_i32_23 = arith.constant 0 : i32
    %34 = arith.cmpi ne, %33, %c0_i32_23 : i32
    scf.if %34 {
      %c0_27 = arith.constant 0 : index
      %c0_28 = arith.constant 0 : index
      %c0_29 = arith.constant 0 : index
      %40 = vector.load %arg11[%c0_27, %c0_28, %c0_29] : memref<2x16x256xf32, #tpu.memory_space<vmem>>, vector<2x16x256xf32>
      %c0_30 = arith.constant 0 : index
      %c0_31 = arith.constant 0 : index
      %c0_32 = arith.constant 0 : index
      %41 = vector.load %arg14[%c0_30, %c0_31, %c0_32] : memref<2x16x256xf32, #tpu.memory_space<vmem>>, vector<2x16x256xf32>
      %42 = arith.addf %40, %41 : vector<2x16x256xf32>
      %c0_33 = arith.constant 0 : index
      %c0_34 = arith.constant 0 : index
      %c0_35 = arith.constant 0 : index
      %43 = vector.load %arg11[%c0_33, %c0_34, %c0_35] : memref<2x16x256xf32, #tpu.memory_space<vmem>>, vector<2x16x256xf32>
      tpu.vector_store %arg11[%c0_33, %c0_34, %c0_35], %42 {strides = array<i32>} : memref<2x16x256xf32, #tpu.memory_space<vmem>>, vector<2x16x256xf32>,
    } else {
    }
    %c1_i32_24 = arith.constant 1 : i32
    %35 = arith.cmpi eq, %arg2, %c1_i32_24 : i32
    %c1_i32_25 = arith.constant 1 : i32
    %36 = arith.cmpi eq, %arg1, %c1_i32_25 : i32
    %37 = arith.andi %35, %36 : i1
    %38 = arith.extui %37 : i1 to i32
    %c0_i32_26 = arith.constant 0 : i32
    %39 = arith.cmpi ne, %38, %c0_i32_26 : i32
    scf.if %39 {
      %c0_27 = arith.constant 0 : index
      %c0_28 = arith.constant 0 : index
      %c0_29 = arith.constant 0 : index
      %40 = vector.load %arg11[%c0_27, %c0_28, %c0_29] : memref<2x16x256xf32, #tpu.memory_space<vmem>>, vector<2x16x256xf32>
      %c0_30 = arith.constant 0 : index
      %c0_31 = arith.constant 0 : index
      %c0_32 = arith.constant 0 : index
      %41 = vector.load %arg14[%c0_30, %c0_31, %c0_32] : memref<2x16x256xf32, #tpu.memory_space<vmem>>, vector<2x16x256xf32>
      %42 = arith.addf %40, %41 : vector<2x16x256xf32>
      %c0_33 = arith.constant 0 : index
      %c0_34 = arith.constant 0 : index
      %43 = vector.load %arg10[%c0_33, %c0_34] : memref<1x256xf32, #tpu.memory_space<vmem>>, vector<1x256xf32>
      %44 = arith.mulf %42, %42 : vector<2x16x256xf32>
      %cst_35 = arith.constant dense<0.000000e+00> : vector<2x16xf32>
      %45 = vector.multi_reduction <add>, %44, %cst_35 [2] : vector<2x16x256xf32> to vector<2x16xf32>
      %46 = vector.shape_cast %45 : vector<2x16xf32> to vector<2x16x1xf32>
      %cst_36 = arith.constant 2.560000e+02 : f32
      %47 = vector.broadcast %cst_36 : f32 to vector<2x16x1xf32>
      %48 = arith.divf %46, %47 : vector<2x16x1xf32>
      %cst_37 = arith.constant 9.99999974E-6 : f32
      %49 = vector.broadcast %cst_37 : f32 to vector<2x16x1xf32>
      %50 = arith.addf %48, %49 : vector<2x16x1xf32>
      %51 = math.rsqrt %50 : vector<2x16x1xf32>
      %52 = vector.broadcast %51 : vector<2x16x1xf32> to vector<2x16x256xf32>
      %53 = arith.mulf %42, %52 : vector<2x16x256xf32>
      %54 = vector.shape_cast %43 : vector<1x256xf32> to vector<1x1x256xf32>
      %55 = vector.broadcast %54 : vector<1x1x256xf32> to vector<2x16x256xf32>
      %56 = arith.mulf %53, %55 : vector<2x16x256xf32>
      %c0_38 = arith.constant 0 : index
      %c0_39 = arith.constant 0 : index
      %c0_40 = arith.constant 0 : index
      %57 = vector.load %arg11[%c0_38, %c0_39, %c0_40] : memref<2x16x256xf32, #tpu.memory_space<vmem>>, vector<2x16x256xf32>
      tpu.vector_store %arg11[%c0_38, %c0_39, %c0_40], %56 {strides = array<i32>} : memref<2x16x256xf32, #tpu.memory_space<vmem>>, vector<2x16x256xf32>,
    } else {
    }
    return
  }
  func.func @transform_1(%arg0: i32, %arg1: i32, %arg2: i32) -> (i32, i32, i32) {
    %c0_i32 = arith.constant 0 : i32
    %c0_i32_0 = arith.constant 0 : i32
    %c0_i32_1 = arith.constant 0 : i32
    return %arg1, %c0_i32, %c0_i32_0 : i32, i32, i32
  }
  func.func @transform_2(%arg0: i32, %arg1: i32, %arg2: i32) -> (i32, i32, i32) {
    %c0_i32 = arith.constant 0 : i32
    %c0_i32_0 = arith.constant 0 : i32
    %c0_i32_1 = arith.constant 0 : i32
    return %arg1, %c0_i32, %c0_i32_0 : i32, i32, i32
  }
  func.func @transform_3(%arg0: i32, %arg1: i32, %arg2: i32) -> (i32, i32, i32, i32) {
    %c0_i32 = arith.constant 0 : i32
    %c0_i32_0 = arith.constant 0 : i32
    %c0_i32_1 = arith.constant 0 : i32
    return %arg1, %arg2, %c0_i32, %c0_i32_0 : i32, i32, i32, i32
  }
  func.func @transform_4(%arg0: i32, %arg1: i32, %arg2: i32) -> (i32, i32, i32, i32) {
    %c0_i32 = arith.constant 0 : i32
    %c0_i32_0 = arith.constant 0 : i32
    %c0_i32_1 = arith.constant 0 : i32
    return %arg1, %arg2, %c0_i32, %c0_i32_0 : i32, i32, i32, i32
  }
  func.func @transform_5(%arg0: i32, %arg1: i32, %arg2: i32) -> (i32, i32, i32) {
    %c0_i32 = arith.constant 0 : i32
    %c0_i32_0 = arith.constant 0 : i32
    %c0_i32_1 = arith.constant 0 : i32
    return %arg1, %c0_i32, %c0_i32_0 : i32, i32, i32
  }
  func.func @transform_6(%arg0: i32, %arg1: i32, %arg2: i32) -> (i32, i32, i32) {
    %c0_i32 = arith.constant 0 : i32
    %c0_i32_0 = arith.constant 0 : i32
    %c0_i32_1 = arith.constant 0 : i32
    return %arg1, %c0_i32, %c0_i32_0 : i32, i32, i32
  }
  func.func @transform_7(%arg0: i32, %arg1: i32, %arg2: i32) -> (i32, i32) {
    %c0_i32 = arith.constant 0 : i32
    %c0_i32_0 = arith.constant 0 : i32
    %c0_i32_1 = arith.constant 0 : i32
    return %c0_i32, %c0_i32_0 : i32, i32
  }
  func.func @transform_8(%arg0: i32, %arg1: i32, %arg2: i32) -> (i32, i32, i32) {
    %c0_i32 = arith.constant 0 : i32
    %c0_i32_0 = arith.constant 0 : i32
    %c0_i32_1 = arith.constant 0 : i32
    return %arg0, %c0_i32, %c0_i32_0 : i32, i32, i32
  }
}

</mosaic_0001>

<bundles_post_ra>
// kernel: tpu_custom_call.1
= control target key start
LH: loop header
LB: loop body
LE: loop exit
PB: predicated region body
PF: predicated region fallthrough
CT: control target
= control target key end

     0   :  { %s5410_s0 = inlined_call_operand.hbm [shape: f32[2,16,256], index: 0, kind: input, shape index: {}]   ;;  %s5411_s1 = inlined_call_operand.hbm [shape: bf16[2,256,768], index: 1, kind: input, shape index: {}]   ;;  %s5412_s2 = inlined_call_operand.hbm [shape: bf16[2,256,256], index: 2, kind: input, shape index: {}]   ;;  %s5413_s3 = inlined_call_operand.hbm [shape: bf16[2,2,256,512], index: 3, kind: input, shape index: {}]   ;;  %s5414_s4 = inlined_call_operand.hbm [shape: bf16[2,2,256,256], index: 4, kind: input, shape index: {}]   ;;  %s5415_s5 = inlined_call_operand.vmem [shape: f32[2,1,256], index: 5, kind: input, shape index: {}]   ;;  %s5416_s6 = inlined_call_operand.vmem [shape: f32[2,1,256], index: 6, kind: input, shape index: {}]   ;;  %s5417_s7 = inlined_call_operand.vmem [shape: f32[1,256], index: 7, kind: input, shape index: {}]   ;;  %s5418_s8 = inlined_call_operand.hbm [shape: f32[2,16,256], index: 8, kind: output, shape index: {}]  }
   0x1   :  { %5429 = sst [smem:[#allocation31_spill]] %s5410_s0 }
   0x2   :  { %5430 = sst [smem:[#allocation32_spill]] %s5411_s1 }
   0x3   :  { %5431 = sst [smem:[#allocation33_spill]] %s5412_s2 }
   0x4   :  { %5432 = sst [smem:[#allocation34_spill]] %s5413_s3 }
   0x5   :  { %5433 = sst [smem:[#allocation35_spill]] %s5415_s5 }
   0x6   :  { %5434 = sst [smem:[#allocation36_spill]] %s5416_s6 }
   0x7   :  { %5435 = sst [smem:[#allocation37_spill]] %s5417_s7 }
   0x8   :  { %5436 = sst [smem:[#allocation38_spill]] %s5418_s8 }
   0x9   :  { %13 = vsyncpa [#allocation7], 0 }
   0xa   :  { %15 = vsyncpa [#allocation7 + $0x1], 0 }
   0xb   :  { %16 = vsyncpa [#allocation10], 0 }
   0xc   :  { %18 = vsyncpa [#allocation10 + $0x1], 0 }
   0xd   :  { %19 = vsyncpa [#allocation13], 0 }
   0xe   :  { %21 = vsyncpa [#allocation13 + $0x1], 0 }
   0xf   :  { %22 = vsyncpa [#allocation8], 0  ;;  %s4656_s27 = smov 0   ;;  %s4658_s28 = smov 0  }
  0x10   :  { %s4660_s29 = smov 0   ;;  %s4662_s30 = smov 0  }
  0x11   :  { %s4664_s9 = smov 0   ;;  %s4666_s10 = smov 0  }
  0x12   :  { %s4668_s11 = smov 0   ;;  %s4670_s12 = smov 0  }
  0x13   :  { %s4672_s13 = smov 0   ;;  %s4674_s14 = smov 0  }
  0x14   :  { %s4676_s15 = smov 0  }
  0x15 LB: > { %5437 = sst [smem:[#allocation25_spill]] %s4558_s28  ;;  %s4710_s16 = sadd.s32 4294967295, %s4594_s15   ;;  %s4594_s15 = sphi %s4676_s15, %s28_s15   ;;  %s4590_s14 = sphi %s4674_s14, %s5483_s14   ;;  %s4586_s13 = sphi %s4672_s13, %s5482_s13   ;;  %s4582_s12 = sphi %s4670_s12, %s5481_s12   ;;  %s4578_s11 = sphi %s4668_s11, %s5480_s11   ;;  %s4574_s10 = sphi %s4666_s10, %s5479_s10   ;;  %s4570_s9 = sphi %s4664_s9, %s5478_s9   ;;  %s4566_s30 = sphi %s4662_s30, %s5477_s30   ;;  %s4562_s29 = sphi %s4660_s29, %s5476_s29   ;;  %s4558_s28 = sphi %s4658_s28, %s5475_s28   ;;  %s4554_s27 = sphi %s4656_s27, %s5473_s27  }
  0x16   : > { %5438 = sst [smem:[#allocation26_spill]] %s4578_s11  ;;  %p61_p0 = scmp.ne.s32.totalorder %s4574_s10, %s4570_s9 }
  0x17   : > { %5439 = sst [smem:[#allocation27_spill]] %s4582_s12  ;;  %p62_p1 = scmp.eq.s32.totalorder %s4594_s15, 0 }
  0x18   : > { %5440 = sst [smem:[#allocation28_spill]] %s4710_s16  ;;  %p67_p2 = scmp.ne.s32.totalorder %s4570_s9, %s4566_s30 }
  0x19   : > { %p68_p3 = scmp.eq.s32.totalorder %s4710_s16, 0  ;;  %p63_p4 = por %p62_p1, %p61_p0 }
  0x1a   : > { %p3776_p6 = scmp.lt.s32.totalorder %s4594_s15, 4  ;;  %s4728_s19 = sand.u32 1, %s4574_s10  }
  0x1b   : > { %p4722_p5 = por %p68_p3, %p67_p2  ;;  %s296_s20 = sand.u32 1, %s4594_s15  }
  0x1c   : > { %p4733_p7 = pnand %p3776_p6, %p63_p4  ;;  %s3357_s22 = sshll.u32 %s4728_s19, 8 }
  0x1d   : > { %s3636_s23 = sshll.u32 %s4590_s14, 12  ;;  %s5443_s2 = sld [smem:[#allocation33_spill]] }
  0x1e   : > { %s300_s30 = scalar_lea.vmem [#allocation9], %s3357_s22  ;;  %p3368_p8 = scmp.ge.s32.totalorder %s4594_s15, 1 }
  0x1f   : > { %s307_s17 = sshll.u32 %s300_s30, 4  ;;  %s4743_s8 = scalar_lea.sflag [#allocation10], %s296_s20  ;;  %s308_s17 = int_to_ptr.vmem [resolvable:$true] %s307_s17 }
  0x20   : > { %p4324_p9 = pneg %p4733_p7  ;;  %s4335_s7 = scalar_lea.vmem %s308_s17, 4096 }
  0x21   : > { %p4336_p10 = scmp.ne.s32.totalorder %s308_s17, %s4335_s7  ;;  %s4596_s0 = smov [#allocation9]  }
  0x22   : > { %s4340_s6 = sshll.u32 %s4596_s0, 4  ;;  %s4341_s6 = int_to_ptr.vmem [resolvable:$false] %s4340_s6 }
  0x23   : > { %s306_s26 = scalar_lea.hbm %s5443_s2, %s3636_s23  ;;  %p4338_p11 = pnand %p4336_p10, %p4324_p9 }
  0x24   : > { %s4342_s5 = scalar_lea.vmem %s4341_s6, 8192  ;;  %p4343_p13 = scmp.lt.s32.totalorder %s308_s17, %s4341_s6 }
  0x25   : > { %p4339_p12 = pneg %p4338_p11  ;;  %p4344_p0 = scmp.lt.s32.totalorder %s4342_s5, %s4335_s7 }
  0x27   : > { %p4345_p2 = por %p4344_p0, %p4343_p13 }
  0x29   : > { %p4346_p4 = pnand %p4345_p2, %p4339_p12 }
  0x2b   : > { %4349 = shalt.err (!%p4346_p4)
}
  0x2c   : > { %s5421_s22 = smov 128   ;;  %s5422_s20 = smov 8  }
  0x2d   : > { %3769 = dma.hbm_to_vmem [thread:$0]  (!%p4733_p7), %s306_s26, 4096, %s308_s17, %s4743_s8, %s5421_s22, %s5421_s22, %s5422_s20  }
  0x2e   : > { %p375_p10 = scmp.lt.s32.totalorder %s4594_s15, 5  ;;  %s3745_s5 = smul.u32 768, %s4728_s19 }
  0x2f   : > { %s3746_s6 = smul.u32 12288, %s4590_s14  ;;  %s5445_s1 = sld [smem:[#allocation32_spill]] }
  0x30   : > { %p4759_p11 = pnand %p3368_p8, %p375_p10  ;;  %s279_s25 = scalar_lea.vmem [#allocation6], %s3745_s5 }
  0x31   : > { %s286_s30 = sshll.u32 %s279_s25, 4  ;;  %s276_s2 = scalar_lea.sflag [#allocation7], %s4728_s19  ;;  %s287_s30 = int_to_ptr.vmem [resolvable:$true] %s286_s30 }
  0x32   : > { %s4363_s11 = scalar_lea.vmem %s287_s30, 12288  ;;  %s4599_s17 = smov [#allocation6]  }
  0x33   : > { %p4364_p12 = scmp.ne.s32.totalorder %s287_s30, %s4363_s11  ;;  %s4368_s26 = sshll.u32 %s4599_s17, 4  ;;  %s4369_s26 = int_to_ptr.vmem [resolvable:$false] %s4368_s26 }
  0x34   : > { %s4370_s22 = scalar_lea.vmem %s4369_s26, 24576  ;;  %p4371_p8 = scmp.lt.s32.totalorder %s287_s30, %s4369_s26 }
  0x35   : > { %s285_s24 = scalar_lea.hbm %s5445_s1, %s3746_s6  ;;  %p4366_p13 = pnand %p4364_p12, %p4324_p9 }
  0x36   : > { %p4372_p2 = scmp.lt.s32.totalorder %s4370_s22, %s4363_s11 }
  0x37   : > { %p4367_p0 = pneg %p4366_p13 }
  0x38   : > { %p4373_p4 = por %p4372_p2, %p4371_p8 }
  0x3a   : > { %p4374_p10 = pnand %p4373_p4, %p4367_p0 }
  0x3c   : > { %4377 = shalt.err (!%p4374_p10)
}
  0x3d   : > { %s4600_s6 = smov 384   ;;  %s4601_s19 = smov 24  }
  0x3e   : > { %3766 = dma.hbm_to_vmem [thread:$0]  (!%p4733_p7), %s285_s24, 12288, %s287_s30, %s276_s2, %s4600_s6, %s4600_s6, %s4601_s19  }
  0x3f   : > { %s40_s11 = sadd.s32 1, %s4586_s13  ;;  %s43_s22 = sadd.s32 1, %s4590_s14 }
  0x40   : > { %p41_p9 = scmp.ge.s32.totalorder %s40_s11, 2  ;;  %s108_s5 = sadd.s32 1, %s4562_s29 }
  0x41   : > { %p115_p12 = scmp.ne.s32.totalorder %s4562_s29, %s4558_s28  ;;  %p121_p0 = scmp.ne.s32.totalorder %s4558_s28, %s4554_s27 }
  0x42   : > { %s5485_s11 = smov (%p41_p9, %s40_s11), 0  ;;  %s5487_s22 = smov (!%p41_p9, %s43_s22), %s4590_s14 }
  0x43   : > { %5446 = sst [smem:[#allocation29_spill]] %s5485_s11  ;;  %s104_s7 = ssub.s32 %s4586_s13, %s5485_s11 }
  0x44   : > { %p4786_p13 = por %p115_p12, %p62_p1  ;;  %p45_p7 = scmp.ge.s32.totalorder %s5487_s22, 2 }
  0x45   : > { %s4793_s2 = sand.u32 1, %s4562_s29   ;;  %s3361_s23 = sshll.u32 %s4586_s13, 7 }
  0x46   : > { %s5489_s22 = smov (%p45_p7, %s5487_s22), 0  ;;  %p4800_p8 = por %p121_p0, %p68_p3 }
  0x47   : > { %s3360_s25 = sshll.u32 %s4793_s2, 9  ;;  %s51_s30 = ssub.s32 %s4590_s14, %s5489_s22 }
  0x48   : > { %s5448_s24 = scalar_select %p4800_p8, 1, 0 }
  0x49   : > { %p52_p1 = scmp.eq.s32.totalorder %s51_s30, 0  ;;  %s105_s17 = sor.u32 %s104_s7, %s51_s30 }
  0x4a   : > { %5449 = sst [smem:[#allocation30_spill]] %s5448_s24  ;;  %p106_p2 = scmp.eq.s32.totalorder %s105_s17, 0 }
  0x4b   : > { %s3362_s27 = sshll.u32 %s4590_s14, 8  ;;  %s5450_s26 = sadd.s32 1, %s4574_s10 }
  0x4c   : > { %s4811_s6 = scalar_select %p52_p1, %s4574_s10, %s5450_s26  }
  0x4d   : > { %s4814_s19 = scalar_select %p106_p2, %s4562_s29, %s108_s5  }
  0x4e   : > { %s327_s20 = sadd.s32 %s3362_s27, %s3361_s23  ;;  %s321_s1 = scalar_lea.vmem [#allocation11], %s3360_s25 }
  0x4f   : > { %s330_s11 = sshll.u32 %s321_s1, 4  ;;  %s3363_s12 = sshll.u32 %s327_s20, 6  ;;  %s331_s11 = int_to_ptr.vmem [resolvable:$true] %s330_s11 }
  0x50   : > { %s5451_s3 = sld [smem:[#allocation34_spill]]  ;;  %p4823_p3 = pnand %p3776_p6, %p4786_p13 }
  0x51   : > { %s4391_s5 = scalar_lea.vmem %s331_s11, 8192  ;;  %s4602_s1 = smov [#allocation11]  }
  0x52   : > { %p4380_p4 = pneg %p4823_p3  ;;  %p4392_p10 = scmp.ne.s32.totalorder %s331_s11, %s4391_s5 }
  0x53   : > { %s4396_s20 = sshll.u32 %s4602_s1, 4  ;;  %s4397_s20 = int_to_ptr.vmem [resolvable:$false] %s4396_s20 }
  0x54   : > { %p4394_p9 = pnand %p4392_p10, %p4380_p4  ;;  %s4398_s28 = scalar_lea.vmem %s4397_s20, 16384 }
  0x55   : > { %p4399_p7 = scmp.lt.s32.totalorder %s331_s11, %s4397_s20  ;;  %p4400_p0 = scmp.lt.s32.totalorder %s4398_s28, %s4391_s5 }
  0x56   : > { %s329_s24 = scalar_lea.hbm %s5451_s3, %s3363_s12  ;;  %p4395_p12 = pneg %p4394_p9 }
  0x57   : > { %p4401_p6 = por %p4400_p0, %p4399_p7 }
  0x59   : > { %p4402_p13 = pnand %p4401_p6, %p4395_p12 }
  0x5b   : > { %4405 = shalt.err (!%p4402_p13)
}
  0x5c   : > { %s4603_s12 = smov 256   ;;  %s4604_s16 = smov 16  }
  0x5d   : > { %3772 = dma.hbm_to_vmem [thread:$0]  (!%p4823_p3), %s329_s24, 8192, %s331_s11, %s4743_s8, %s4603_s12, %s4603_s12, %s4604_s16  }
  0x5e   : > { %s3364_s21 = sshll.u32 %s4793_s2, 8  ;;  %s3365_s23 = sshll.u32 %s4586_s13, 6 }
  0x5f   : > { %s3366_s25 = sshll.u32 %s4590_s14, 7  ;;  %s344_s17 = scalar_lea.vmem [#allocation12], %s3364_s21 }
  0x60   : > { %s350_s30 = sadd.s32 %s3366_s25, %s3365_s23  ;;  %s353_s27 = sshll.u32 %s344_s17, 4  ;;  %s354_s27 = int_to_ptr.vmem [resolvable:$true] %s353_s27 }
  0x61   : > { %s3367_s26 = sshll.u32 %s350_s30, 6  ;;  %s341_s28 = scalar_lea.sflag [#allocation13], %s4793_s2 }
  0x62   : > { %s352_s20 = scalar_lea.hbm %s5414_s4, %s3367_s26  ;;  %s4419_s3 = scalar_lea.vmem %s354_s27, 4096 }
  0x63   : > { %p4420_p1 = scmp.ne.s32.totalorder %s354_s27, %s4419_s3  ;;  %s4605_s8 = smov [#allocation12]  }
  0x64   : > { %s4424_s11 = sshll.u32 %s4605_s8, 4  ;;  %s4425_s11 = int_to_ptr.vmem [resolvable:$false] %s4424_s11 }
  0x65   : > { %p4422_p2 = pnand %p4420_p1, %p4380_p4  ;;  %s4426_s24 = scalar_lea.vmem %s4425_s11, 8192 }
  0x66   : > { %p4427_p9 = scmp.lt.s32.totalorder %s354_s27, %s4425_s11  ;;  %p4428_p12 = scmp.lt.s32.totalorder %s4426_s24, %s4419_s3 }
  0x67   : > { %p4423_p10 = pneg %p4422_p2 }
  0x68   : > { %p4429_p7 = por %p4428_p12, %p4427_p9 }
  0x6a   : > { %p4430_p0 = pnand %p4429_p7, %p4423_p10 }
  0x6c   : > { %4433 = shalt.err (!%p4430_p0)
}
  0x6d   : > { %s5453_s12 = smov 8   ;;  %s5454_s16 = smov 128  }
  0x6e   : > { %3775 = dma.hbm_to_vmem [thread:$0]  (!%p4823_p3), %s352_s20, 4096, %s354_s27, %s341_s28, %s5454_s16, %s5454_s16, %s5453_s12  }
  0x6f   : > { %379 = sbr.rel (%p4759_p11) target bundleno = 2916 (0xb64), region = 48  ;;  %s381_s2 = sand.u32 (!%p4759_p11), 1, %s4570_s9  }
  0x70   : > { %s3747_s21 = smul.u32 (!%p4759_p11), 768, %s381_s2  ;;  %s382_s23 = scalar_lea.sflag (!%p4759_p11), [#allocation7], %s381_s2 }
  0x72   : > { %s4853_s25 = scalar_lea.vmem (!%p4759_p11), [#allocation6], %s3747_s21 }
  0x74   : > { %4529 = dma.done.wait (%p4722_p5), %s382_s23, 12288  }
  0x75   : > { %4531 = vsyncadd (%p4722_p5), %s382_s23, 4294955008  ;;  %s5455_s3 = sld [smem:[#allocation28_spill]]  ;;  %s3369_s30 = sshll.u32 %s381_s2, 8 }
  0x76   : > { %s4860_s27 = scalar_lea.vmem [#allocation9], %s3369_s30 }
  0x7b   : > { %s390_s7 = sand.u32 1, %s5455_s3  }
  0x7c   : > { %s391_s17 = scalar_lea.sflag [#allocation10], %s390_s7 }
  0x7d   : > { %4533 = dma.done.wait (%p4722_p5), %s391_s17, 4096  }
  0x7e   : > { %4535 = vsyncadd (%p4722_p5), %s391_s17, 4294963200  ;;  %s5456_s0 = sld [smem:[#allocation25_spill]] }
  0x84   : > { %s401_s5 = sand.u32 1, %s5456_s0  }
  0x85   : > { %s3370_s1 = sshll.u32 %s401_s5, 9 }
  0x86   : > { %s4867_s20 = scalar_lea.vmem [#allocation11], %s3370_s1 }
  0x87   : > { %4537 = dma.done.wait (%p4800_p8), %s391_s17, 8192  }
  0x88   : > { %4539 = vsyncadd (%p4800_p8), %s391_s17, 4294959104  ;;  %s3371_s28 = sshll.u32 %s401_s5, 8  ;;  %s409_s8 = scalar_lea.sflag [#allocation13], %s401_s5 }
  0x89   : > { %s4873_s11 = scalar_lea.vmem [#allocation12], %s3371_s28 }
  0x8a   : > { %4541 = dma.done.wait (%p4800_p8), %s409_s8, 4096  }
  0x8b   : > { %4543 = vsyncadd (%p4800_p8), %s409_s8, 4294963200  ;;  %s5458_s18 = sld [smem:[#allocation27_spill]]  ;;  %s4606_s16 = smov [#allocation14]  }
  0x8c   : > { %s5459_s24 = sld [smem:[#allocation26_spill]]  ;;  %s488_s2 = sshll.u32 %s4606_s16, 4  ;;  %s4889_s2 = int_to_ptr.vmem [resolvable:$true] %s488_s2 }
  0x8d   : > { %s5461_s7 = sld [smem:[#allocation35_spill]]  ;;  %s4904_s1 = scalar_lea.vmem %s4889_s2, 1024 }
  0x8e   : > { %s5462_s26 = sld [smem:[#allocation36_spill]]  ;;  %p4446_p6 = scmp.ne.s32.totalorder %s4889_s2, %s4904_s1 }
  0x8f   : > { %p4453_p2 = scmp.lt.s32.totalorder %s4889_s2, %s4889_s2  ;;  %p4454_p10 = scmp.lt.s32.totalorder %s4904_s1, %s4904_s1 }
  0x91   : > { %p461_p5 = scmp.lt.s32.totalorder %s5458_s18, 1  ;;  %p471_p11 = scmp.eq.s32.totalorder %s5458_s18, 0 }
  0x92   : > { %p472_p3 = scmp.eq.s32.totalorder %s5459_s24, 0  ;;  %p4915_p9 = por %p4454_p10, %p4453_p2 }
  0x93   : > { %s5491_s18 = smov (!%p461_p5, %s5458_s18), 1 }
  0x94   : > { %p4885_p4 = pnand %p472_p3, %p471_p11  ;;  %s3372_s21 = sshll.u32 %s5491_s18, 1 }
  0x95   : > { %s4894_s30 = scalar_lea.vmem %s5461_s7, %s3372_s21  ;;  %s4899_s5 = scalar_lea.vmem %s5462_s26, %s3372_s21 }
  0x96   : > { %p3756_p8 = pneg %p4885_p4 }
  0x98   : > { %p4448_p13 = pnand %p4446_p6, %p3756_p8 }
  0x9a   : > { %p4449_p1 = pneg %p4448_p13 }
  0x9c   : > { %p4456_p12 = pnand %p4915_p9, %p4449_p1 }
  0x9e   : > { %4459 = shalt.err (!%p4456_p12)  }
  0x9f   : > { %s5464_s16 = sld [smem:[#allocation31_spill]] }
  0xa5   : > { %3757 = dma.hbm_to_vmem [thread:$0]  (!%p4885_p4), %s5464_s16, 1024, %s4889_s2, [#allocation5] }
  0xa6   : > { %4545 = dma.done.wait (%p3756_p8), [#allocation5], 1024 }
  0xa7   : > { %4547 = vsyncadd (%p3756_p8), [#allocation5], 4294966272  ;;  %p3374_p7 = scmp.ne.s32.totalorder %s5459_s24, 0 }
  0xa9   : > { %499 = sbr.rel (%p3374_p7) target bundleno = 2178 (0x882), region = 76 }
  0xae   : > { %v4928_v0 = vld [vmem:[#allocation14] sm:$0xff]  ;;  %v4930_v1 = vld [vmem:[#allocation14 + $0x8] sm:$0xff]  ;;  %v4932_v2 = vld [vmem:[#allocation14 + $0x10] sm:$0xff]  ;;  %vm4608_vm0 = vmmov 0   ;;  %vm1406_vm1 = vcmask 130048  }
  0xaf   : > { %v509_v3 = vmul.f32 %v4928_v0, %v4928_v0  ;;  %v510_v4 = vmul.f32 %v4930_v1, %v4930_v1  ;;  %v4938_v5 = vld [vmem:[#allocation14 + $0x18] sm:$0xff]  ;;  %v511_v6 = vmul.f32 %v4932_v2, %v4932_v2  ;;  %v4942_v7 = vld [vmem:[#allocation14 + $0x20] sm:$0xff]  ;;  %v4944_v8 = vld [vmem:[#allocation14 + $0x28] sm:$0xff] }
  0xb0   : > { %v512_v9 = vmul.f32 %v4938_v5, %v4938_v5  ;;  %v513_v10 = vmul.f32 %v4942_v7, %v4942_v7  ;;  %v514_v11 = vmul.f32 %v4944_v8, %v4944_v8  ;;  %v4952_v12 = vld [vmem:[#allocation14 + $0x30] sm:$0xff]  ;;  %v4954_v13 = vld [vmem:[#allocation14 + $0x38] sm:$0xff]  ;;  %v3887_v26 = vld [vmem:[%s4853_s25 + $0x12c] ss:$24 sps:$4 sm:$0xff]  }
  0xb1   : > { %v517_v14 = vadd.f32 %v510_v4, %v509_v3  ;;  %v515_v15 = vmul.f32 %v4952_v12, %v4952_v12  ;;  %v516_v16 = vmul.f32 %v4954_v13, %v4954_v13  ;;  %v3878_v17 = vld [vmem:[%s4853_s25 + $0x154] ss:$24 sps:$4 sm:$0xff]   ;;  %v3880_v18 = vld [vmem:[%s4853_s25 + $0x150] ss:$24 sps:$4 sm:$0xff]   ;;  %v3884_v24 = vld [vmem:[%s4853_s25 + $0x124] ss:$24 sps:$4 sm:$0xff]  }
  0xb2   : > { %v523_v19 = vadd.f32 %v514_v11, %v513_v10  ;;  %v3881_v20 = vld [vmem:[%s4853_s25 + $0x15c] ss:$24 sps:$4 sm:$0xff]   ;;  %v520_v21 = vadd.f32 %v512_v9, %v511_v6  ;;  %1149 = vmatprep.subr.bf16.mxu0 %v3878_v17  ;;  %v3883_v22 = vld [vmem:[%s4853_s25 + $0x158] ss:$24 sps:$4 sm:$0xff]   ;;  %v3889_v27 = vld [vmem:[%s4853_s25 + $0x128] ss:$24 sps:$4 sm:$0xff]  }
  0xb3   : > { %518 = vadd.xlane.f32.xlu0 %v517_v14  ;;  %v526_v23 = vadd.f32 %v516_v16, %v515_v15  ;;  %1150 = vmatpush1.bf16.msra.mxu0 %v3880_v18  ;;  %v3886_v25 = vld [vmem:[%s4853_s25 + $0x120] ss:$24 sps:$4 sm:$0xff]   ;;  %v3890_v28 = vld [vmem:[%s4853_s25 + $0xf4] ss:$24 sps:$4 sm:$0xff]   ;;  %v3892_v29 = vld [vmem:[%s4853_s25 + $0xf0] ss:$24 sps:$4 sm:$0xff]  }
  0xb4   : > { %524 = vadd.xlane.f32.xlu1 %v523_v19  ;;  %1202 = vmatprep.subr.bf16.mxu1 %v3881_v20  ;;  %v3893_v30 = vld [vmem:[%s4853_s25 + $0xfc] ss:$24 sps:$4 sm:$0xff]   ;;  %v3895_v32 = vld [vmem:[%s4853_s25 + $0xf8] ss:$24 sps:$4 sm:$0xff]   ;;  %v3899_v33 = vld [vmem:[%s4853_s25 + $0xcc] ss:$24 sps:$4 sm:$0xff]  }
  0xb5   : > { %1203 = vmatpush1.bf16.msra.mxu1 %v3883_v22  ;;  %1151 = vmatprep.subr.bf16.mxu0 %v3884_v24  ;;  %v3896_v31 = vld [vmem:[%s4853_s25 + $0xc4] ss:$24 sps:$4 sm:$0xff]   ;;  %v3898_v34 = vld [vmem:[%s4853_s25 + $0xc0] ss:$24 sps:$4 sm:$0xff]   ;;  %v3902_v35 = vld [vmem:[%s4853_s25 + $0x94] ss:$24 sps:$4 sm:$0xff]  }
  0xb6   : > { %1204 = vmatprep.subr.bf16.mxu1 %v3887_v26  ;;  %v3901_v36 = vld [vmem:[%s4853_s25 + $0xc8] ss:$24 sps:$4 sm:$0xff]   ;;  %v3905_v37 = vld [vmem:[%s4853_s25 + $0x9c] ss:$24 sps:$4 sm:$0xff]   ;;  %v3907_v40 = vld [vmem:[%s4853_s25 + $0x98] ss:$24 sps:$4 sm:$0xff]  }
  0xb7   : > { %521 = vadd.xlane.f32.xlu0 %v520_v21  ;;  %1152 = vmatpush1.bf16.msra.mxu0 %v3886_v25  ;;  %v3904_v38 = vld [vmem:[%s4853_s25 + $0x90] ss:$24 sps:$4 sm:$0xff]   ;;  %v3908_v39 = vld [vmem:[%s4853_s25 + $0x64] ss:$24 sps:$4 sm:$0xff]   ;;  %v3910_v42 = vld [vmem:[%s4853_s25 + $0x60] ss:$24 sps:$4 sm:$0xff]  }
  0xb8   : > { %527 = vadd.xlane.f32.xlu1 %v526_v23  ;;  %1153 = vmatprep.subr.bf16.mxu0 %v3890_v28  ;;  %v3911_v41 = vld [vmem:[%s4853_s25 + $0x6c] ss:$24 sps:$4 sm:$0xff]   ;;  %v3913_v44 = vld [vmem:[%s4853_s25 + $0x68] ss:$24 sps:$4 sm:$0xff]   ;;  %v3917_v45 = vld [vmem:[%s4853_s25 + $0x3c] ss:$24 sps:$4 sm:$0xff]  }
  0xb9   : > { %1205 = vmatpush1.bf16.msra.mxu1 %v3889_v27  ;;  %v3914_v43 = vld [vmem:[%s4853_s25 + $0x34] ss:$24 sps:$4 sm:$0xff]   ;;  %v3916_v46 = vld [vmem:[%s4853_s25 + $0x30] ss:$24 sps:$4 sm:$0xff]   ;;  %v3920_v47 = vld [vmem:[%s4853_s25 + $0x4] ss:$24 sps:$4 sm:$0xff]  }
  0xba   : > { %1206 = vmatprep.subr.bf16.mxu1 %v3893_v30  ;;  %v3919_v48 = vld [vmem:[%s4853_s25 + $0x38] ss:$24 sps:$4 sm:$0xff]   ;;  %v3923_v49 = vld [vmem:[%s4853_s25 + $0xc] ss:$24 sps:$4 sm:$0xff]   ;;  %v3925_v52 = vld [vmem:[%s4853_s25 + $0x8] ss:$24 sps:$4 sm:$0xff]  }
  0xbb   : > { %1154 = vmatpush1.bf16.msra.mxu0 %v3892_v29  ;;  %v3922_v50 = vld [vmem:[%s4853_s25] ss:$24 sps:$4 sm:$0xff]   ;;  %v3926_v51 = vld [vmem:[%s4853_s25 + $0x2d4] ss:$24 sps:$4 sm:$0xff]   ;;  %v3928_v54 = vld [vmem:[%s4853_s25 + $0x2d0] ss:$24 sps:$4 sm:$0xff]  }
  0xbc   : > { %1155 = vmatprep.subr.bf16.mxu0 %v3896_v31  ;;  %v3929_v53 = vld [vmem:[%s4853_s25 + $0x2dc] ss:$24 sps:$4 sm:$0xff]   ;;  %v3931_v56 = vld [vmem:[%s4853_s25 + $0x2d8] ss:$24 sps:$4 sm:$0xff]   ;;  %v3935_v57 = vld [vmem:[%s4853_s25 + $0x2ac] ss:$24 sps:$4 sm:$0xff]  }
  0xbd   : > { %1207 = vmatpush1.bf16.msra.mxu1 %v3895_v32  ;;  %v3932_v55 = vld [vmem:[%s4853_s25 + $0x2a4] ss:$24 sps:$4 sm:$0xff]   ;;  %v3934_v58 = vld [vmem:[%s4853_s25 + $0x2a0] ss:$24 sps:$4 sm:$0xff]   ;;  %v3938_v59 = vld [vmem:[%s4853_s25 + $0x274] ss:$24 sps:$4 sm:$0xff]  }
  0xbe   : > { %1208 = vmatprep.subr.bf16.mxu1 %v3899_v33  ;;  %v3937_v60 = vld [vmem:[%s4853_s25 + $0x2a8] ss:$24 sps:$4 sm:$0xff]   ;;  %v3941_v61 = vld [vmem:[%s4853_s25 + $0x27c] ss:$24 sps:$4 sm:$0xff]   ;;  %v3943_v3 = vld [vmem:[%s4853_s25 + $0x278] ss:$24 sps:$4 sm:$0xff]  }
  0xbf   : > { %1156 = vmatpush1.bf16.msra.mxu0 %v3898_v34  ;;  %v3940_v62 = vld [vmem:[%s4853_s25 + $0x270] ss:$24 sps:$4 sm:$0xff]   ;;  %v3944_v63 = vld [vmem:[%s4853_s25 + $0x244] ss:$24 sps:$4 sm:$0xff]   ;;  %v3946_v6 = vld [vmem:[%s4853_s25 + $0x240] ss:$24 sps:$4 sm:$0xff]  }
  0xc0   : > { %1157 = vmatprep.subr.bf16.mxu0 %v3902_v35  ;;  %v3947_v4 = vld [vmem:[%s4853_s25 + $0x24c] ss:$24 sps:$4 sm:$0xff]   ;;  %v3949_v10 = vld [vmem:[%s4853_s25 + $0x248] ss:$24 sps:$4 sm:$0xff]   ;;  %v3953_v14 = vld [vmem:[%s4853_s25 + $0x21c] ss:$24 sps:$4 sm:$0xff]  }
  0xc1   : > { %1209 = vmatpush1.bf16.msra.mxu1 %v3901_v36  ;;  %v3950_v9 = vld [vmem:[%s4853_s25 + $0x214] ss:$24 sps:$4 sm:$0xff]   ;;  %v3952_v11 = vld [vmem:[%s4853_s25 + $0x210] ss:$24 sps:$4 sm:$0xff]   ;;  %v3956_v15 = vld [vmem:[%s4853_s25 + $0x1e4] ss:$24 sps:$4 sm:$0xff]  }
  0xc2   : > { %1210 = vmatprep.subr.bf16.mxu1 %v3905_v37  ;;  %v3955_v16 = vld [vmem:[%s4853_s25 + $0x218] ss:$24 sps:$4 sm:$0xff]   ;;  %v3959_v18 = vld [vmem:[%s4853_s25 + $0x1ec] ss:$24 sps:$4 sm:$0xff]   ;;  %v3961_v20 = vld [vmem:[%s4853_s25 + $0x1e8] ss:$24 sps:$4 sm:$0xff]  }
  0xc3   : > { %1158 = vmatpush1.bf16.msra.mxu0 %v3904_v38  ;;  %v3958_v17 = vld [vmem:[%s4853_s25 + $0x1e0] ss:$24 sps:$4 sm:$0xff]   ;;  %v3962_v19 = vld [vmem:[%s4853_s25 + $0x1b4] ss:$24 sps:$4 sm:$0xff]   ;;  %v3964_v21 = vld [vmem:[%s4853_s25 + $0x1b0] ss:$24 sps:$4 sm:$0xff]  }
  0xc4   : > { %1159 = vmatprep.subr.bf16.mxu0 %v3908_v39  ;;  %v3965_v22 = vld [vmem:[%s4853_s25 + $0x1bc] ss:$24 sps:$4 sm:$0xff]   ;;  %v3967_v24 = vld [vmem:[%s4853_s25 + $0x1b8] ss:$24 sps:$4 sm:$0xff]   ;;  %v3971_v26 = vld [vmem:[%s4853_s25 + $0x18c] ss:$24 sps:$4 sm:$0xff]  }
  0xc5   : > { %1211 = vmatpush1.bf16.msra.mxu1 %v3907_v40  ;;  %v3968_v23 = vld [vmem:[%s4853_s25 + $0x184] ss:$24 sps:$4 sm:$0xff]   ;;  %v3970_v25 = vld [vmem:[%s4853_s25 + $0x180] ss:$24 sps:$4 sm:$0xff]  }
  0xc6   : > { %1212 = vmatprep.subr.bf16.mxu1 %v3911_v41  ;;  %v3976_v27 = vld [vmem:[%s4853_s25 + $0x164] ss:$24 sps:$4 sm:$0xff]   ;;  %v3973_v28 = vld [vmem:[%s4853_s25 + $0x188] ss:$24 sps:$4 sm:$0xff]   ;;  %v551_v41 = vlaneseq }
  0xc7   : > { %1160 = vmatpush1.bf16.msra.mxu0 %v3910_v42 }
  0xc8   : > { %1161 = vmatprep.subr.bf16.mxu0 %v3914_v43  ;;  %v5025_v42 = vshrl.u32 %v551_v41, 7 }
  0xc9   : > { %1213 = vmatpush1.bf16.msra.mxu1 %v3913_v44 }
  0xca   : > { %1214 = vmatprep.subr.bf16.mxu1 %v3917_v45  ;;  %v557_v43 = vsub.s32 1, %v5025_v42  ;;  %v553_v44 = vsub.s32 0, %v5025_v42 }
  0xcb   : > { %1162 = vmatpush1.bf16.msra.mxu0 %v3916_v46  ;;  %v508_v46 = vld [vmem:[%s4894_s30] sm:$0x3] }
  0xcc   : > { %1163 = vmatprep.subr.bf16.mxu0 %v3920_v47 }
  0xcd   : > { %1215 = vmatpush1.bf16.msra.mxu1 %v3919_v48 }
  0xce   : > { %1216 = vmatprep.subr.bf16.mxu1 %v3923_v49 }
  0xcf   : > { %1164 = vmatpush1.bf16.msra.mxu0 %v3922_v50  ;;  %v558_v50 = vrot.slane %v508_v46, %v557_v43 }
  0xd0   : > { %1165 = vmatprep.subr.bf16.mxu0 %v3926_v51 }
  0xd1   : > { %1217 = vmatpush1.bf16.msra.mxu1 %v3925_v52  ;;  %v554_v52 = vrot.slane %v508_v46, %v553_v44 }
  0xd2   : > { %1218 = vmatprep.subr.bf16.mxu1 %v3929_v53 }
  0xd3   : > { %1166 = vmatpush2.bf16.msra.mxu0 %v3928_v54 }
  0xd4   : > { %1167 = vmatprep.subr.bf16.mxu0 %v3932_v55 }
  0xd5   : > { %1219 = vmatpush2.bf16.msra.mxu1 %v3931_v56 }
  0xd6   : > { %1220 = vmatprep.subr.bf16.mxu1 %v3935_v57 }
  0xd7   : > { %1168 = vmatpush2.bf16.msra.mxu0 %v3934_v58 }
  0xd8   : > { %1169 = vmatprep.subr.bf16.mxu0 %v3938_v59 }
  0xd9   : > { %1221 = vmatpush2.bf16.msra.mxu1 %v3937_v60 }
  0xda   : > { %1222 = vmatprep.subr.bf16.mxu1 %v3941_v61 }
  0xdb   : > { %1170 = vmatpush2.bf16.msra.mxu0 %v3940_v62  ;;  %v3974_v62 = vld [vmem:[%s4853_s25 + $0x160] ss:$24 sps:$4 sm:$0xff]  }
  0xdc   : > { %1171 = vmatprep.subr.bf16.mxu0 %v3944_v63 }
  0xdd   : > { %1223 = vmatpush2.bf16.msra.mxu1 %v3943_v3  ;;  %v3979_v3 = vld [vmem:[%s4853_s25 + $0x134] ss:$24 sps:$4 sm:$0xff]  }
  0xde   : > { %1224 = vmatprep.subr.bf16.mxu1 %v3947_v4 }
  0xdf   : > { %1172 = vmatpush2.bf16.msra.mxu0 %v3946_v6  ;;  %v3982_v6 = vld [vmem:[%s4853_s25 + $0x104] ss:$24 sps:$4 sm:$0xff]  }
  0xe0   : > { %1173 = vmatprep.subr.bf16.mxu0 %v3950_v9  ;;  %v3980_v9 = vld [vmem:[%s4853_s25 + $0x100] ss:$24 sps:$4 sm:$0xff]  }
  0xe1   : > { %1225 = vmatpush2.bf16.msra.mxu1 %v3949_v10 }
  0xe2   : > { %1226 = vmatprep.subr.bf16.mxu1 %v3953_v14  ;;  %v3983_v14 = vld [vmem:[%s4853_s25 + $0xd0] ss:$24 sps:$4 sm:$0xff]  }
  0xe3   : > { %1174 = vmatpush2.bf16.msra.mxu0 %v3952_v11  ;;  %v3985_v11 = vld [vmem:[%s4853_s25 + $0xd4] ss:$24 sps:$4 sm:$0xff]  }
  0xe4   : > { %1175 = vmatprep.subr.bf16.mxu0 %v3956_v15  ;;  %v3988_v15 = vld [vmem:[%s4853_s25 + $0xa4] ss:$24 sps:$4 sm:$0xff]  }
  0xe5   : > { %1227 = vmatpush2.bf16.msra.mxu1 %v3955_v16  ;;  %v3986_v16 = vld [vmem:[%s4853_s25 + $0xa0] ss:$24 sps:$4 sm:$0xff]  }
  0xe6   : > { %1228 = vmatprep.subr.bf16.mxu1 %v3959_v18  ;;  %v3989_v18 = vld [vmem:[%s4853_s25 + $0x70] ss:$24 sps:$4 sm:$0xff]  }
  0xe7   : > { %1176 = vmatpush2.bf16.msra.mxu0 %v3958_v17  ;;  %v3991_v17 = vld [vmem:[%s4853_s25 + $0x74] ss:$24 sps:$4 sm:$0xff]  }
  0xe8   : > { %1177 = vmatprep.subr.bf16.mxu0 %v3962_v19  ;;  %v3994_v19 = vld [vmem:[%s4853_s25 + $0x44] ss:$24 sps:$4 sm:$0xff]  }
  0xe9   : > { %1229 = vmatpush2.bf16.msra.mxu1 %v3961_v20  ;;  %v3992_v20 = vld [vmem:[%s4853_s25 + $0x40] ss:$24 sps:$4 sm:$0xff]  }
  0xea   : > { %1230 = vmatprep.subr.bf16.mxu1 %v3965_v22  ;;  %v3995_v22 = vld [vmem:[%s4853_s25 + $0x10] ss:$24 sps:$4 sm:$0xff]  }
  0xeb   : > { %1178 = vmatpush2.bf16.msra.mxu0 %v3964_v21  ;;  %v3997_v21 = vld [vmem:[%s4853_s25 + $0x14] ss:$24 sps:$4 sm:$0xff]  }
  0xec   : > { %1179 = vmatprep.subr.bf16.mxu0 %v3968_v23  ;;  %v4000_v23 = vld [vmem:[%s4853_s25 + $0x2e4] ss:$24 sps:$4 sm:$0xff]  }
  0xed   : > { %1231 = vmatpush2.bf16.msra.mxu1 %v3967_v24  ;;  %v3998_v24 = vld [vmem:[%s4853_s25 + $0x2e0] ss:$24 sps:$4 sm:$0xff]  }
  0xee   : > { %1232 = vmatprep.subr.bf16.mxu1 %v3971_v26  ;;  %v4001_v26 = vld [vmem:[%s4853_s25 + $0x2b0] ss:$24 sps:$4 sm:$0xff]  }
  0xef   : > { %1180 = vmatpush2.bf16.msra.mxu0 %v3970_v25  ;;  %v4003_v25 = vld [vmem:[%s4853_s25 + $0x2b4] ss:$24 sps:$4 sm:$0xff]  }
  0xf0   : > { %1255 = vmatprep.subr.bf16.mxu0 %v3976_v27  ;;  %v4006_v27 = vld [vmem:[%s4853_s25 + $0x284] ss:$24 sps:$4 sm:$0xff]  }
  0xf1   : > { %1233 = vmatpush2.bf16.msra.mxu1 %v3973_v28  ;;  %v4004_v28 = vld [vmem:[%s4853_s25 + $0x280] ss:$24 sps:$4 sm:$0xff]  }
 0x13c   : > { %v519_v29 = vpop.xlane.xlu0 %518 }
 0x13d   : > { %v530_v30 = vmul.f32 0.00390625, %v519_v29  ;;  %v525_v31 = vpop.xlane.xlu1 %524  ;;  %v4009_v29 = vld [vmem:[%s4853_s25 + $0x254] ss:$24 sps:$4 sm:$0xff]  }
 0x13e   : > { %v532_v32 = vmul.f32 0.00390625, %v525_v31  ;;  %v4012_v31 = vld [vmem:[%s4853_s25 + $0x224] ss:$24 sps:$4 sm:$0xff]  }
 0x13f   : > { %v534_v33 = vadd.f32 1e-05, %v530_v30  ;;  %v4007_v30 = vld [vmem:[%s4853_s25 + $0x250] ss:$24 sps:$4 sm:$0xff]  }
 0x140   : > { %v522_v34 = vpop.xlane.xlu0 %521  ;;  %v536_v35 = vadd.f32 1e-05, %v532_v32  ;;  %v4010_v32 = vld [vmem:[%s4853_s25 + $0x220] ss:$24 sps:$4 sm:$0xff]  }
 0x141   : > { %4076 = vrsqrt.f32 %v534_v33  ;;  %v531_v36 = vmul.f32 0.00390625, %v522_v34  ;;  %v528_v37 = vpop.xlane.xlu1 %527  ;;  %v4015_v33 = vld [vmem:[%s4853_s25 + $0x1f4] ss:$24 sps:$4 sm:$0xff]   ;;  %v4013_v34 = vld [vmem:[%s4853_s25 + $0x1f0] ss:$24 sps:$4 sm:$0xff]  }
 0x142   : > { %4078 = vrsqrt.f32 %v536_v35  ;;  %v533_v38 = vmul.f32 0.00390625, %v528_v37  ;;  %v4018_v35 = vld [vmem:[%s4853_s25 + $0x1c4] ss:$24 sps:$4 sm:$0xff]   ;;  %v4021_v37 = vld [vmem:[%s4853_s25 + $0x194] ss:$24 sps:$4 sm:$0xff]  }
 0x143   : > { %v535_v39 = vadd.f32 1e-05, %v531_v36  ;;  %v4016_v36 = vld [vmem:[%s4853_s25 + $0x1c0] ss:$24 sps:$4 sm:$0xff]  }
 0x144   : > { %v537_v40 = vadd.f32 1e-05, %v533_v38  ;;  %v4019_v38 = vld [vmem:[%s4853_s25 + $0x190] ss:$24 sps:$4 sm:$0xff]  }
 0x145   : > { %4080 = vrsqrt.f32 %v535_v39  ;;  %v4607_v39 = vmov 0.0  }
 0x146   : > { %4082 = vrsqrt.f32 %v537_v40  ;;  %3665 = vmatprep.subr.bf16.mxu1 %v4607_v39  ;;  %2174 = vst [vmem:[#allocation4] sm:$0xff] %v4607_v39  ;;  %2175 = vst [vmem:[#allocation4 + $0x38] sm:$0xff] %v4607_v39 }
 0x147   : > { %2176 = vst [vmem:[#allocation4 + $0x8] sm:$0xff] %v4607_v39  ;;  %2177 = vst [vmem:[#allocation4 + $0x18] sm:$0xff] %v4607_v39 }
 0x148   : > { %2178 = vst [vmem:[#allocation4 + $0x20] sm:$0xff] %v4607_v39  ;;  %2179 = vst [vmem:[#allocation4 + $0x10] sm:$0xff] %v4607_v39 }
 0x149   : > { %2180 = vst [vmem:[#allocation4 + $0x30] sm:$0xff] %v4607_v39  ;;  %2181 = vst [vmem:[#allocation4 + $0x28] sm:$0xff] %v4607_v39 }
 0x14e   : > { %v4077_v45 = vpop.eup %4076 }
 0x14f   : > { %v4079_v47 = vpop.eup %4078  ;;  %v543_v49 = vmul.f32 %v4077_v45, %v4930_v1  ;;  %v542_v51 = vmul.f32 %v4077_v45, %v4928_v0 }
 0x150   : > { %v547_v48 = vmul.f32 %v4079_v47, %v4944_v8 }
 0x151   : > { %v562_v1 = vmul.f32 %v558_v50, %v543_v49  ;;  %v561_v59 = vmul.f32 %v554_v52, %v542_v51 }
 0x152   : > { %v4081_v53 = vpop.eup %4080  ;;  %v566_v57 = vmul.f32 %v558_v50, %v547_v48 }
 0x153   : > { %v4083_v54 = vpop.eup %4082  ;;  %v545_v55 = vmul.f32 %v4081_v53, %v4938_v5  ;;  %v544_v56 = vmul.f32 %v4081_v53, %v4932_v2  ;;  %v546_v2 = vmul.f32 %v4079_v47, %v4942_v7 }
 0x154   : > { %v549_v8 = vmul.f32 %v4083_v54, %v4954_v13  ;;  %v548_v5 = vmul.f32 %v4083_v54, %v4952_v12  ;;  %v3977_v13 = vld [vmem:[%s4853_s25 + $0x130] ss:$24 sps:$4 sm:$0xff]  }
 0x155   : > { %v564_v58 = vmul.f32 %v558_v50, %v545_v55  ;;  %v563_v60 = vmul.f32 %v554_v52, %v544_v56  ;;  %v565_v7 = vmul.f32 %v554_v52, %v546_v2 }
 0x156   : > { %v568_v61 = vmul.f32 %v558_v50, %v549_v8  ;;  %v567_v12 = vmul.f32 %v554_v52, %v548_v5 }
 0x157   : > { %v570_v0 = vpack.c.bf16 %v564_v58, %v562_v1  ;;  %v5041_v63 = vpack.c.bf16 %v563_v60, %v561_v59 }
 0x158   : > { %v5044_v4 = vpack.c.bf16 %v568_v61, %v566_v57  ;;  %v5055_v10 = vpack.c.bf16 %v567_v12, %v565_v7 }
 0x159   : > { %1181 = vmatprep.mubr.bf16.mxu0 %v570_v0  ;;  %1234 = vmatprep.mubr.bf16.mxu1 %v570_v0 }
 0x15a   : > { %1182 = vmatmul.mubr.bf16.vlgmr.msra.gmra.mxu0 %v5041_v63  ;;  %1235 = vmatmul.mubr.bf16.vlgmr.msra.gmra.mxu1 %v5041_v63 }
 0x15b   : > { %1256 = vmatpush1.bf16.msra.mxu0 %v3974_v62  ;;  %1191 = vmatprep.mubr.bf16.mxu0 %v5044_v4 }
 0x15c   : > { %1257 = vmatprep.subr.bf16.mxu0 %v3979_v3  ;;  %1244 = vmatprep.mubr.bf16.mxu1 %v5044_v4 }
 0x15f   : > { %1258 = vmatpush1.bf16.msra.mxu0 %v3977_v13 }
 0x160   : > { %1259 = vmatprep.subr.bf16.mxu0 %v3982_v6 }
 0x162   : > { %1192 = vmatmul.mubr.bf16.gmra.mxu0 %v5055_v10  ;;  %1245 = vmatmul.mubr.bf16.gmra.mxu1 %v5055_v10 }
 0x163   : > { %1260 = vmatpush1.bf16.msra.mxu0 %v3980_v9  ;;  %1287 = vmatprep.mubr.bf16.mxu0 %v570_v0 }
 0x164   : > { %1261 = vmatprep.subr.bf16.mxu0 %v3985_v11  ;;  %3667 = vmatprep.mubr.msk.bf16.mxu1 %vm4608_vm0, %v4607_v39 }
 0x167   : > { %1262 = vmatpush1.bf16.msra.mxu0 %v3983_v14 }
 0x168   : > { %1263 = vmatprep.subr.bf16.mxu0 %v3988_v15 }
 0x16b   : > { %1264 = vmatpush1.bf16.msra.mxu0 %v3986_v16 }
 0x16c   : > { %1265 = vmatprep.subr.bf16.mxu0 %v3991_v17 }
 0x16f   : > { %1266 = vmatpush1.bf16.msra.mxu0 %v3989_v18 }
 0x170   : > { %1267 = vmatprep.subr.bf16.mxu0 %v3994_v19 }
 0x173   : > { %1268 = vmatpush1.bf16.msra.mxu0 %v3992_v20 }
 0x174   : > { %1269 = vmatprep.subr.bf16.mxu0 %v3997_v21 }
 0x177   : > { %1270 = vmatpush1.bf16.msra.mxu0 %v3995_v22 }
 0x178   : > { %1271 = vmatprep.subr.bf16.mxu0 %v4000_v23 }
 0x17b   : > { %1272 = vmatpush2.bf16.msra.mxu0 %v3998_v24 }
 0x17c   : > { %1273 = vmatprep.subr.bf16.mxu0 %v4003_v25 }
 0x17f   : > { %1274 = vmatpush2.bf16.msra.mxu0 %v4001_v26 }
 0x180   : > { %1275 = vmatprep.subr.bf16.mxu0 %v4006_v27 }
 0x183   : > { %1276 = vmatpush2.bf16.msra.mxu0 %v4004_v28 }
 0x184   : > { %1277 = vmatprep.subr.bf16.mxu0 %v4009_v29 }
 0x187   : > { %1278 = vmatpush2.bf16.msra.mxu0 %v4007_v30 }
 0x188   : > { %1279 = vmatprep.subr.bf16.mxu0 %v4012_v31 }
 0x18b   : > { %1280 = vmatpush2.bf16.msra.mxu0 %v4010_v32 }
 0x18c   : > { %1281 = vmatprep.subr.bf16.mxu0 %v4015_v33 }
 0x18f   : > { %1282 = vmatpush2.bf16.msra.mxu0 %v4013_v34 }
 0x190   : > { %1283 = vmatprep.subr.bf16.mxu0 %v4018_v35 }
 0x193   : > { %1284 = vmatpush2.bf16.msra.mxu0 %v4016_v36 }
 0x194   : > { %1285 = vmatprep.subr.bf16.mxu0 %v4021_v37 }
 0x197   : > { %1286 = vmatpush2.bf16.msra.mxu0 %v4019_v38 }
 0x19a   : > { %1288 = vmatmul.mubr.bf16.vlgmr.msra.gmra.mxu0 %v5041_v63 }
 0x19b   : > { %1297 = vmatprep.mubr.bf16.mxu0 %v5044_v4 }
 0x1a2   : > { %1298 = vmatmul.mubr.bf16.gmra.mxu0 %v5055_v10 }
 0x21a   : > { %v1183_v40 = vpop.f32.mrf.mxu0  ;;  %v1236_v41 = vpop.f32.mrf.mxu1 }
 0x21c   : > { %v5099_v45 = vpop.f32.mrf.mxu0  ;;  %v5101_v46 = vpop.f32.mrf.mxu1 }
 0x21e   : > { %v1187_v47 = vpop.f32.mrf.mxu0  ;;  %v1240_v48 = vpop.f32.mrf.mxu1 }
 0x21f   : > { %v1312_v49 = vpack.c.bf16 %v1240_v48, %v1236_v41  ;;  %v1308_v57 = vpack.c.bf16 %v1187_v47, %v1183_v40 }
 0x220   : > { %v5103_v50 = vpop.f32.mrf.mxu0  ;;  %v5105_v51 = vpop.f32.mrf.mxu1 }
 0x221   : > { %v1309_v52 = vpack.c.bf16 %v5103_v50, %v5099_v45  ;;  %v1313_v53 = vpack.c.bf16 %v5105_v51, %v5101_v46  ;;  %3666 = vmatpush3.bf16.xpose.msra.mxu1 %v1312_v49 }
 0x222   : > { %v1193_v54 = vpop.f32.mrf.mxu0  ;;  %v1246_v55 = vpop.f32.mrf.mxu1  ;;  %3671 = vmatprep.subr.bf16.mxu1 %v4607_v39 }
 0x224   : > { %v5112_v56 = vpop.f32.mrf.mxu0  ;;  %v5114_v8 = vpop.f32.mrf.mxu1 }
 0x226   : > { %v1197_v1 = vpop.f32.mrf.mxu0  ;;  %v1250_v58 = vpop.f32.mrf.mxu1 }
 0x227   : > { %v1314_v59 = vpack.c.bf16 %v1250_v58, %v1246_v55  ;;  %v1310_v0 = vpack.c.bf16 %v1197_v1, %v1193_v54 }
 0x228   : > { %v5116_v60 = vpop.f32.mrf.mxu0  ;;  %3668 = vmatmul.mubr.bf16.vlgmr.msra.gmra.mxu1 %v1308_v57  ;;  %v5128_v2 = vpop.f32.mrf.mxu1 }
 0x229   : > { %v1311_v61 = vpack.c.bf16 %v5116_v60, %v5112_v56  ;;  %3672 = vmatpush3.bf16.xpose.msra.mxu1 %v1314_v59  ;;  %3673 = vmatprep.mubr.msk.bf16.mxu1 %vm4608_vm0, %v4607_v39 }
 0x22a   : > { %3677 = vmatprep.subr.bf16.mxu1 %v4607_v39 }
 0x230   : > { %3674 = vmatmul.mubr.bf16.vlgmr.msra.gmra.mxu1 %v1310_v0 }
 0x231   : > { %3679 = vmatprep.mubr.msk.bf16.mxu1 %vm4608_vm0, %v4607_v39 }
 0x25a   : > { %v1289_v62 = vpop.f32.mrf.mxu0 }
 0x25c   : > { %v5125_v63 = vpop.f32.mrf.mxu0 }
 0x25e   : > { %v1293_v3 = vpop.f32.mrf.mxu0 }
 0x25f   : > { %v1316_v4 = vpack.c.bf16 %v1293_v3, %v1289_v62 }
 0x260   : > { %v1295_v54 = vpop.f32.mrf.mxu0 }
 0x261   : > { %3678 = vmatpush3.bf16.msra.mxu1 %v1316_v4  ;;  %v1317_v46 = vpack.c.bf16 %v1295_v54, %v5125_v63 }
 0x262   : > { %3683 = vmatprep.subr.bf16.mxu1 %v4607_v39  ;;  %v1299_v57 = vpop.f32.mrf.mxu0 }
 0x264   : > { %v5138_v58 = vpop.f32.mrf.mxu0 }
 0x266   : > { %v1303_v62 = vpop.f32.mrf.mxu0 }
 0x2e8   : > { %v1354_v5 = vpop.f32.mrf.mxu1 }
 0x2e9   : > { %v1402_v13 = vmul.f32 0.088388346, %v1354_v5 }
 0x2ea   : > { %v3669_v6 = vpop.f32.mrf.mxu1 }
 0x2eb   : > { %v1407_v7 = vsel %vm1406_vm1, %v1402_v13, -inf }
 0x2ec   : > { %1408 = vmax.xlane.f32.xlu0 %v1407_v7  ;;  %v1357_v12 = vpop.f32.mrf.mxu1 }
 0x2ed   : > { %v1403_v9 = vmul.f32 0.088388346, %v1357_v12 }
 0x2ee   : > { %v3670_v10 = vpop.f32.mrf.mxu1 }
 0x2ef   : > { %v1410_v11 = vsel %vm1406_vm1, %v1403_v9, -inf }
 0x2f0   : > { %1411 = vmax.xlane.f32.xlu1 %v1410_v11  ;;  %v1395_v14 = vpop.f32.mrf.mxu1  ;;  %v1315_v11 = vpack.c.bf16 %v5128_v2, %v5114_v8 }
 0x2f1   : > { %v1404_v15 = vmul.f32 0.088388346, %v1395_v14 }
 0x2f2   : > { %v3675_v16 = vpop.f32.mrf.mxu1 }
 0x2f3   : > { %v1413_v17 = vsel %vm1406_vm1, %v1404_v15, -inf }
 0x2f4   : > { %1414 = vmax.xlane.f32.xlu0 %v1413_v17  ;;  %v1398_v18 = vpop.f32.mrf.mxu1 }
 0x2f5   : > { %v1405_v19 = vmul.f32 0.088388346, %v1398_v18 }
 0x2f6   : > { %v3676_v20 = vpop.f32.mrf.mxu1 }
 0x2f7   : > { %v1416_v21 = vsel %vm1406_vm1, %v1405_v19, -inf }
 0x2f8   : > { %1417 = vmax.xlane.f32.xlu1 %v1416_v21 }
 0x375   : > { %v1409_v22 = vpop.xlane.xlu0 %1408 }
 0x376   : > { %v1419_v23 = vsub.f32 %v1402_v13, %v1409_v22  ;;  %v1318_v13 = vpack.c.bf16 %v1303_v62, %v1299_v57 }
 0x378   : > { %v1423_v24 = vmul.f32 1.442695, %v1419_v23 }
 0x379   : > { %v1412_v25 = vpop.xlane.xlu1 %1411 }
 0x37a   : > { %4084 = vpow2.f32 %v1423_v24  ;;  %v1420_v26 = vsub.f32 %v1403_v9, %v1412_v25 }
 0x37c   : > { %v1425_v27 = vmul.f32 1.442695, %v1420_v26 }
 0x37d   : > { %v1415_v28 = vpop.xlane.xlu0 %1414 }
 0x37e   : > { %4086 = vpow2.f32 %v1425_v27  ;;  %v1421_v29 = vsub.f32 %v1404_v15, %v1415_v28 }
 0x380   : > { %v1427_v30 = vmul.f32 1.442695, %v1421_v29 }
 0x381   : > { %v1418_v31 = vpop.xlane.xlu1 %1417 }
 0x382   : > { %4088 = vpow2.f32 %v1427_v30  ;;  %v1422_v32 = vsub.f32 %v1405_v19, %v1418_v31 }
 0x384   : > { %v1429_v33 = vmul.f32 1.442695, %v1422_v32 }
 0x386   : > { %4090 = vpow2.f32 %v1429_v33 }
 0x387   : > { %v4085_v34 = vpop.eup %4084 }
 0x388   : > { %v1431_v35 = vsel %vm1406_vm1, %v4085_v34, 0.0 }
 0x389   : > { %1432 = vadd.xlane.f32.xlu0 %v1431_v35 }
 0x38b   : > { %v4087_v36 = vpop.eup %4086 }
 0x38c   : > { %v1434_v37 = vsel %vm1406_vm1, %v4087_v36, 0.0 }
 0x38d   : > { %1435 = vadd.xlane.f32.xlu1 %v1434_v37 }
 0x38f   : > { %v4089_v38 = vpop.eup %4088 }
 0x390   : > { %v1437_v40 = vsel %vm1406_vm1, %v4089_v38, 0.0 }
 0x391   : > { %1438 = vadd.xlane.f32.xlu0 %v1437_v40 }
 0x393   : > { %v4091_v41 = vpop.eup %4090 }
 0x394   : > { %v1440_v47 = vsel %vm1406_vm1, %v4091_v41, 0.0 }
 0x395   : > { %1441 = vadd.xlane.f32.xlu1 %v1440_v47 }
 0x412   : > { %v1433_v48 = vpop.xlane.xlu0 %1432 }
 0x413   : > { %4092 = vrcp.f32 %v1433_v48 }
 0x416   : > { %v1436_v49 = vpop.xlane.xlu1 %1435 }
 0x417   : > { %4094 = vrcp.f32 %v1436_v49 }
 0x41a   : > { %v1439_v55 = vpop.xlane.xlu0 %1438 }
 0x41b   : > { %4096 = vrcp.f32 %v1439_v55 }
 0x41e   : > { %v1442_v1 = vpop.xlane.xlu1 %1441 }
 0x41f   : > { %4098 = vrcp.f32 %v1442_v1 }
 0x420   : > { %v4093_v59 = vpop.eup %4092 }
 0x421   : > { %v1447_v3 = vmul.f32 %v4093_v59, %v4085_v34 }
 0x424   : > { %v4095_v0 = vpop.eup %4094 }
 0x425   : > { %v1448_v4 = vmul.f32 %v4095_v0, %v4087_v36 }
 0x427   : > { %v1451_v5 = vpack.c.bf16 %v1448_v4, %v1447_v3  ;;  %v4022_v3 = vld [vmem:[%s4860_s27 + $0x70] ss:$8 sps:$4 sm:$0xff]   ;;  %v4024_v4 = vld [vmem:[%s4860_s27 + $0x74] ss:$8 sps:$4 sm:$0xff]  }
 0x428   : > { %v4097_v6 = vpop.eup %4096  ;;  %2017 = vmatprep.subr.bf16.mxu0 %v4024_v4 }
 0x429   : > { %3680 = vmatmul.mubr.msk.bf16.vlgmr.msra.gmra.mxu1 %vm1406_vm1, %v1451_v5  ;;  %v1449_v12 = vmul.f32 %v4097_v6, %v4089_v38  ;;  %v4027_v5 = vld [vmem:[%s4860_s27 + $0x64] ss:$8 sps:$4 sm:$0xff]   ;;  %2018 = vmatpush1.bf16.msra.mxu0 %v4022_v3  ;;  %v4030_v6 = vld [vmem:[%s4860_s27 + $0x54] ss:$8 sps:$4 sm:$0xff]  }
 0x42a   : > { %3684 = vmatpush3.bf16.msra.mxu1 %v1318_v13  ;;  %3685 = vmatprep.mubr.msk.bf16.mxu1 %vm4608_vm0, %v4607_v39  ;;  %v4025_v13 = vld [vmem:[%s4860_s27 + $0x60] ss:$8 sps:$4 sm:$0xff]  }
 0x42b   : > { %3689 = vmatprep.subr.bf16.mxu1 %v4607_v39  ;;  %2019 = vmatprep.subr.bf16.mxu0 %v4027_v5 }
 0x42c   : > { %v4099_v7 = vpop.eup %4098 }
 0x42d   : > { %v1450_v9 = vmul.f32 %v4099_v7, %v4091_v41  ;;  %2020 = vmatpush1.bf16.msra.mxu0 %v4025_v13  ;;  %v4028_v7 = vld [vmem:[%s4860_s27 + $0x50] ss:$8 sps:$4 sm:$0xff]  }
 0x42e   : > { %2021 = vmatprep.subr.bf16.mxu0 %v4030_v6  ;;  %v4124_v6 = vld [vmem:[#allocation14] sm:$0xff] }
 0x42f   : > { %v1452_v10 = vpack.c.bf16 %v1450_v9, %v1449_v12  ;;  %v4033_v12 = vld [vmem:[%s4860_s27 + $0x44] ss:$8 sps:$4 sm:$0xff]   ;;  %v4031_v9 = vld [vmem:[%s4860_s27 + $0x40] ss:$8 sps:$4 sm:$0xff]  }
 0x431   : > { %3686 = vmatmul.mubr.msk.bf16.vlgmr.msra.gmra.mxu1 %vm1406_vm1, %v1452_v10  ;;  %2022 = vmatpush1.bf16.msra.mxu0 %v4028_v7  ;;  %v4036_v10 = vld [vmem:[%s4860_s27 + $0x34] ss:$8 sps:$4 sm:$0xff]  }
 0x432   : > { %3690 = vmatpush3.bf16.xpose.msra.mxu1 %v1313_v53  ;;  %3691 = vmatprep.mubr.msk.bf16.mxu1 %vm4608_vm0, %v4607_v39 }
 0x433   : > { %3695 = vmatprep.subr.bf16.mxu1 %v4607_v39  ;;  %2023 = vmatprep.subr.bf16.mxu0 %v4033_v12 }
 0x435   : > { %2024 = vmatpush1.bf16.msra.mxu0 %v4031_v9  ;;  %v4125_v9 = vld [vmem:[#allocation14 + $0x8] sm:$0xff] }
 0x436   : > { %2025 = vmatprep.subr.bf16.mxu0 %v4036_v10 }
 0x439   : > { %3692 = vmatmul.mubr.bf16.vlgmr.msra.gmra.mxu1 %v1309_v52 }
 0x43a   : > { %3696 = vmatpush3.bf16.xpose.msra.mxu1 %v1315_v11  ;;  %3697 = vmatprep.mubr.msk.bf16.mxu1 %vm4608_vm0, %v4607_v39  ;;  %v4034_v11 = vld [vmem:[%s4860_s27 + $0x30] ss:$8 sps:$4 sm:$0xff]  }
 0x43b   : > { %3701 = vmatprep.subr.bf16.mxu1 %v4607_v39  ;;  %2026 = vmatpush1.bf16.msra.mxu0 %v4034_v11 }
 0x441   : > { %3698 = vmatmul.mubr.bf16.vlgmr.msra.gmra.mxu1 %v1311_v61 }
 0x442   : > { %3702 = vmatpush3.bf16.msra.mxu1 %v1317_v46  ;;  %3703 = vmatprep.mubr.msk.bf16.mxu1 %vm4608_vm0, %v4607_v39  ;;  %v4039_v46 = vld [vmem:[%s4860_s27 + $0x24] ss:$8 sps:$4 sm:$0xff]  }
 0x443   : > { %3707 = vmatprep.subr.bf16.mxu1 %v4607_v39  ;;  %2027 = vmatprep.subr.bf16.mxu0 %v4039_v46  ;;  %v4126_v46 = vld [vmem:[#allocation14 + $0x10] sm:$0xff] }
 0x4e9   : > { %v1490_v45 = vpop.f32.mrf.mxu1 }
 0x4ea   : > { %v3637_v50 = vpack.c.bf16 %v1490_v45, %v1490_v45  ;;  %v4037_v45 = vld [vmem:[%s4860_s27 + $0x20] ss:$8 sps:$4 sm:$0xff]  }
 0x4eb   : > { %v3681_v51 = vpop.f32.mrf.mxu1  ;;  %2028 = vmatpush1.bf16.msra.mxu0 %v4037_v45 }
 0x4ec   : > { %1557 = vst [vmem:[#allocation2] sm:$0xf] %v3637_v50  ;;  %v4042_v50 = vld [vmem:[%s4860_s27 + $0x14] ss:$8 sps:$4 sm:$0xff]   ;;  %v4040_v51 = vld [vmem:[%s4860_s27 + $0x10] ss:$8 sps:$4 sm:$0xff]  }
 0x4ed   : > { %v1493_v52 = vpop.f32.mrf.mxu1  ;;  %2029 = vmatprep.subr.bf16.mxu0 %v4042_v50 }
 0x4ee   : > { %v3638_v53 = vpack.c.bf16 %v1493_v52, %v1493_v52  ;;  %v4045_v52 = vld [vmem:[%s4860_s27 + $0x4] ss:$8 sps:$4 sm:$0xff]  }
 0x4ef   : > { %v3682_v8 = vpop.f32.mrf.mxu1  ;;  %2030 = vmatpush1.bf16.msra.mxu0 %v4040_v51 }
 0x4f0   : > { %1558 = vst [vmem:[#allocation2 + $0x8] sm:$0xf] %v3638_v53  ;;  %v4043_v53 = vld [vmem:[%s4860_s27] ss:$8 sps:$4 sm:$0xff]   ;;  %2031 = vmatprep.subr.bf16.mxu0 %v4045_v52  ;;  %v4048_v8 = vld [vmem:[%s4860_s27 + $0xf4] ss:$8 sps:$4 sm:$0xff]  }
 0x4f1   : > { %v1534_v2 = vpop.f32.mrf.mxu1 }
 0x4f2   : > { %v3639_v63 = vpack.c.bf16 %v1534_v2, %v1534_v2  ;;  %v4046_v2 = vld [vmem:[%s4860_s27 + $0xf0] ss:$8 sps:$4 sm:$0xff]  }
 0x4f3   : > { %v3687_v14 = vpop.f32.mrf.mxu1  ;;  %2032 = vmatpush1.bf16.msra.mxu0 %v4043_v53  ;;  %v4127_v53 = vld [vmem:[#allocation14 + $0x18] sm:$0xff] }
 0x4f4   : > { %1559 = vst [vmem:[#allocation2 + $0x10] sm:$0xf] %v3639_v63  ;;  %2033 = vmatprep.subr.bf16.mxu0 %v4048_v8  ;;  %v4051_v63 = vld [vmem:[%s4860_s27 + $0xe4] ss:$8 sps:$4 sm:$0xff]   ;;  %v4049_v14 = vld [vmem:[%s4860_s27 + $0xe0] ss:$8 sps:$4 sm:$0xff]  }
 0x4f5   : > { %v1537_v56 = vpop.f32.mrf.mxu1 }
 0x4f6   : > { %v3640_v60 = vpack.c.bf16 %v1537_v56, %v1537_v56  ;;  %v4054_v56 = vld [vmem:[%s4860_s27 + $0xd4] ss:$8 sps:$4 sm:$0xff]  }
 0x4f7   : > { %v3688_v61 = vpop.f32.mrf.mxu1  ;;  %2034 = vmatpush2.bf16.msra.mxu0 %v4046_v2 }
 0x4f8   : > { %1560 = vst [vmem:[#allocation2 + $0x18] sm:$0xf] %v3640_v60  ;;  %2035 = vmatprep.subr.bf16.mxu0 %v4051_v63  ;;  %v4052_v60 = vld [vmem:[%s4860_s27 + $0xd0] ss:$8 sps:$4 sm:$0xff]   ;;  %v4057_v61 = vld [vmem:[%s4860_s27 + $0xc4] ss:$8 sps:$4 sm:$0xff]  }
 0x4f9   : > { %v1595_v15 = vpop.f32.mrf.mxu1 }
 0x4fa   : > { %v1643_v16 = vmul.f32 0.088388346, %v1595_v15  ;;  %v4055_v15 = vld [vmem:[%s4860_s27 + $0xc0] ss:$8 sps:$4 sm:$0xff]  }
 0x4fb   : > { %v3693_v17 = vpop.f32.mrf.mxu1  ;;  %2036 = vmatpush2.bf16.msra.mxu0 %v4049_v14  ;;  %v4128_v14 = vld [vmem:[#allocation14 + $0x20] sm:$0xff] }
 0x4fc   : > { %v1647_v18 = vsel %vm1406_vm1, %v1643_v16, -inf  ;;  %2037 = vmatprep.subr.bf16.mxu0 %v4054_v56 }
 0x4fd   : > { %1648 = vmax.xlane.f32.xlu0 %v1647_v18  ;;  %v1598_v19 = vpop.f32.mrf.mxu1 }
 0x4fe   : > { %v1644_v20 = vmul.f32 0.088388346, %v1598_v19 }
 0x4ff   : > { %v3694_v21 = vpop.f32.mrf.mxu1  ;;  %2038 = vmatpush2.bf16.msra.mxu0 %v4052_v60  ;;  %v4075_v5 = vld [vmem:[#allocation2 + $0x10] ss:$8 sps:$4 sm:$0xff]  }
 0x500   : > { %v1650_v22 = vsel %vm1406_vm1, %v1644_v20, -inf  ;;  %2039 = vmatprep.subr.bf16.mxu0 %v4057_v61 }
 0x501   : > { %1651 = vmax.xlane.f32.xlu1 %v1650_v22  ;;  %v1636_v23 = vpop.f32.mrf.mxu1  ;;  %v1305_v22 = vpop.f32.mrf.mxu0 }
 0x502   : > { %v1645_v24 = vmul.f32 0.088388346, %v1636_v23 }
 0x503   : > { %v3699_v25 = vpop.f32.mrf.mxu1  ;;  %2040 = vmatpush2.bf16.msra.mxu0 %v4055_v15 }
 0x504   : > { %v1653_v26 = vsel %vm1406_vm1, %v1645_v24, -inf }
 0x505   : > { %1654 = vmax.xlane.f32.xlu0 %v1653_v26  ;;  %v1639_v27 = vpop.f32.mrf.mxu1  ;;  %v1319_v26 = vpack.c.bf16 %v1305_v22, %v5138_v58  ;;  %v4060_v58 = vld [vmem:[%s4860_s27 + $0xb4] ss:$8 sps:$4 sm:$0xff]  }
 0x506   : > { %v1646_v28 = vmul.f32 0.088388346, %v1639_v27  ;;  %2041 = vmatprep.subr.bf16.mxu0 %v4060_v58 }
 0x507   : > { %v3700_v29 = vpop.f32.mrf.mxu1 }
 0x508   : > { %v1656_v30 = vsel %vm1406_vm1, %v1646_v28, -inf }
 0x509   : > { %1657 = vmax.xlane.f32.xlu1 %v1656_v30 }
 0x586   : > { %v1649_v31 = vpop.xlane.xlu0 %1648 }
 0x587   : > { %v1659_v32 = vsub.f32 %v1643_v16, %v1649_v31 }
 0x589   : > { %v1663_v33 = vmul.f32 1.442695, %v1659_v32  ;;  %v4058_v32 = vld [vmem:[%s4860_s27 + $0xb0] ss:$8 sps:$4 sm:$0xff]  }
 0x58a   : > { %v1652_v34 = vpop.xlane.xlu1 %1651  ;;  %2042 = vmatpush2.bf16.msra.mxu0 %v4058_v32 }
 0x58b   : > { %4100 = vpow2.f32 %v1663_v33  ;;  %v1660_v35 = vsub.f32 %v1644_v20, %v1652_v34  ;;  %v4063_v33 = vld [vmem:[%s4860_s27 + $0xa4] ss:$8 sps:$4 sm:$0xff]   ;;  %v4061_v34 = vld [vmem:[%s4860_s27 + $0xa0] ss:$8 sps:$4 sm:$0xff]  }
 0x58c   : > { %2043 = vmatprep.subr.bf16.mxu0 %v4063_v33 }
 0x58d   : > { %v1665_v36 = vmul.f32 1.442695, %v1660_v35  ;;  %v4066_v35 = vld [vmem:[%s4860_s27 + $0x94] ss:$8 sps:$4 sm:$0xff]  }
 0x58e   : > { %v1655_v37 = vpop.xlane.xlu0 %1654  ;;  %2044 = vmatpush2.bf16.msra.mxu0 %v4061_v34 }
 0x58f   : > { %4102 = vpow2.f32 %v1665_v36  ;;  %v1661_v38 = vsub.f32 %v1645_v24, %v1655_v37  ;;  %2045 = vmatprep.subr.bf16.mxu0 %v4066_v35  ;;  %v4069_v36 = vld [vmem:[%s4860_s27 + $0x84] ss:$8 sps:$4 sm:$0xff]   ;;  %v4067_v37 = vld [vmem:[%s4860_s27 + $0x80] ss:$8 sps:$4 sm:$0xff]  }
 0x591   : > { %v1667_v40 = vmul.f32 1.442695, %v1661_v38 }
 0x592   : > { %v1658_v41 = vpop.xlane.xlu1 %1657 }
 0x593   : > { %4104 = vpow2.f32 %v1667_v40  ;;  %v1662_v47 = vsub.f32 %v1646_v28, %v1658_v41 }
 0x595   : > { %v1669_v48 = vmul.f32 1.442695, %v1662_v47 }
 0x597   : > { %4106 = vpow2.f32 %v1669_v48 }
 0x598   : > { %v5170_v49 = vpop.eup %4100 }
 0x599   : > { %v1671_v54 = vsel %vm1406_vm1, %v5170_v49, 0.0 }
 0x59a   : > { %1672 = vadd.xlane.f32.xlu0 %v1671_v54 }
 0x59c   : > { %v5174_v55 = vpop.eup %4102 }
 0x59d   : > { %v1674_v57 = vsel %vm1406_vm1, %v5174_v55, 0.0 }
 0x59e   : > { %1675 = vadd.xlane.f32.xlu1 %v1674_v57 }
 0x5a0   : > { %v5178_v1 = vpop.eup %4104 }
 0x5a1   : > { %v1677_v59 = vsel %vm1406_vm1, %v5178_v1, 0.0 }
 0x5a2   : > { %1678 = vadd.xlane.f32.xlu0 %v1677_v59 }
 0x5a4   : > { %v5182_v0 = vpop.eup %4106 }
 0x5a5   : > { %v1680_v62 = vsel %vm1406_vm1, %v5182_v0, 0.0 }
 0x5a6   : > { %1681 = vadd.xlane.f32.xlu1 %v1680_v62  ;;  %v4070_v62 = vld [vmem:[#allocation2] ss:$8 sps:$4 sm:$0xff]  }
 0x623   : > { %v1673_v16 = vpop.xlane.xlu0 %1672 }
 0x624   : > { %4108 = vrcp.f32 %v1673_v16  ;;  %v4129_v16 = vld [vmem:[#allocation14 + $0x28] sm:$0xff] }
 0x627   : > { %v1676_v17 = vpop.xlane.xlu1 %1675 }
 0x628   : > { %4110 = vrcp.f32 %v1676_v17 }
 0x62b   : > { %v1679_v18 = vpop.xlane.xlu0 %1678 }
 0x62c   : > { %4112 = vrcp.f32 %v1679_v18 }
 0x62f   : > { %v1682_v19 = vpop.xlane.xlu1 %1681 }
 0x630   : > { %4114 = vrcp.f32 %v1682_v19 }
 0x631   : > { %v4109_v20 = vpop.eup %4108 }
 0x632   : > { %v1687_v23 = vmul.f32 %v4109_v20, %v5170_v49  ;;  %v4130_v20 = vld [vmem:[#allocation14 + $0x30] sm:$0xff] }
 0x635   : > { %v4111_v21 = vpop.eup %4110 }
 0x636   : > { %v1688_v24 = vmul.f32 %v4111_v21, %v5174_v55 }
 0x638   : > { %v1691_v25 = vpack.c.bf16 %v1688_v24, %v1687_v23 }
 0x639   : > { %v4113_v27 = vpop.eup %4112 }
 0x63a   : > { %3704 = vmatmul.mubr.msk.bf16.vlgmr.msra.gmra.mxu1 %vm1406_vm1, %v1691_v25  ;;  %v1689_v29 = vmul.f32 %v4113_v27, %v5178_v1  ;;  %v4131_v25 = vld [vmem:[#allocation14 + $0x38] sm:$0xff] }
 0x63b   : > { %3708 = vmatpush3.bf16.msra.mxu1 %v1319_v26  ;;  %3709 = vmatprep.mubr.msk.bf16.mxu1 %vm4608_vm0, %v4607_v39  ;;  %v4064_v39 = vld [vmem:[%s4860_s27 + $0x90] ss:$8 sps:$4 sm:$0xff]  }
 0x63c   : > { %2046 = vmatpush2.bf16.msra.mxu0 %v4064_v39 }
 0x63d   : > { %v4115_v28 = vpop.eup %4114  ;;  %2047 = vmatprep.subr.bf16.mxu0 %v4069_v36 }
 0x63e   : > { %v1690_v30 = vmul.f32 %v4115_v28, %v5182_v0 }
 0x640   : > { %v1692_v31 = vpack.c.bf16 %v1690_v30, %v1689_v29  ;;  %2048 = vmatpush2.bf16.msra.mxu0 %v4067_v37 }
 0x642   : > { %3710 = vmatmul.mubr.msk.bf16.vlgmr.msra.gmra.mxu1 %vm1406_vm1, %v1692_v31 }
 0x6fa   : > { %v1730_v38 = vpop.f32.mrf.mxu1 }
 0x6fb   : > { %v3641_v40 = vpack.c.bf16 %v1730_v38, %v1730_v38 }
 0x6fc   : > { %v3705_v41 = vpop.f32.mrf.mxu1 }
 0x6fd   : > { %1797 = vst [vmem:[#allocation2 + $0x4] sm:$0xf] %v3641_v40  ;;  %v2086_v41 = vld [vmem:[%s4899_s5] sm:$0x3] }
 0x6fe   : > { %v1733_v47 = vpop.f32.mrf.mxu1 }
 0x6ff   : > { %v3642_v48 = vpack.c.bf16 %v1733_v47, %v1733_v47 }
 0x700   : > { %v3706_v49 = vpop.f32.mrf.mxu1 }
 0x701   : > { %1798 = vst [vmem:[#allocation2 + $0xc] sm:$0xf] %v3642_v48  ;;  %v2135_v48 = vrot.slane %v2086_v41, %v557_v43  ;;  %v2131_v49 = vrot.slane %v2086_v41, %v553_v44 }
 0x702   : > { %v1774_v54 = vpop.f32.mrf.mxu1 }
 0x703   : > { %v3643_v55 = vpack.c.bf16 %v1774_v54, %v1774_v54 }
 0x704   : > { %v3711_v57 = vpop.f32.mrf.mxu1 }
 0x705   : > { %1799 = vst [vmem:[#allocation2 + $0x14] sm:$0xf] %v3643_v55 }
 0x706   : > { %v1777_v1 = vpop.f32.mrf.mxu1 }
 0x707   : > { %v3644_v59 = vpack.c.bf16 %v1777_v1, %v1777_v1 }
 0x708   : > { %v3712_v0 = vpop.f32.mrf.mxu1  ;;  %v4072_v3 = vld [vmem:[#allocation2 + $0x4] ss:$8 sps:$4 sm:$0xff]  }
 0x709   : > { %1800 = vst [vmem:[#allocation2 + $0x1c] sm:$0xf] %v3644_v59  ;;  %2049 = vmatprep.mubr.bf16.mxu0 %v4072_v3 }
 0x70a   : > { %2050 = vmatmul.mubr.bf16.vlgmr.msra.gmra.mxu0 %v4070_v62 }
 0x710   : > { %v4073_v4 = vld [vmem:[#allocation2 + $0x14] ss:$8 sps:$4 sm:$0xff]  }
 0x711   : > { %2059 = vmatprep.mubr.bf16.mxu0 %v4073_v4 }
 0x712   : > { %2060 = vmatmul.mubr.bf16.gmra.mxu0 %v4075_v5 }
 0x7ca   : > { %v2051_v13 = vpop.f32.mrf.mxu0 }
 0x7cb   : > { %v5227_v7 = vadd.f32 %v4124_v6, %v2051_v13 }
 0x7cc   : > { %v2053_v12 = vpop.f32.mrf.mxu0 }
 0x7cd   : > { %2078 = vst [vmem:[#allocation14] sm:$0xff] %v5227_v7  ;;  %v5230_v10 = vadd.f32 %v4125_v9, %v2053_v12  ;;  %v2087_v50 = vmul.f32 %v5227_v7, %v5227_v7 }
 0x7ce   : > { %v2055_v11 = vpop.f32.mrf.mxu0 }
 0x7cf   : > { %2079 = vst [vmem:[#allocation14 + $0x8] sm:$0xff] %v5230_v10  ;;  %v5233_v45 = vadd.f32 %v4126_v46, %v2055_v11  ;;  %v2088_v51 = vmul.f32 %v5230_v10, %v5230_v10 }
 0x7d0   : > { %v2057_v52 = vpop.f32.mrf.mxu0 }
 0x7d1   : > { %2080 = vst [vmem:[#allocation14 + $0x10] sm:$0xff] %v5233_v45  ;;  %v2073_v8 = vadd.f32 %v4127_v53, %v2057_v52  ;;  %v2095_v2 = vadd.f32 %v2088_v51, %v2087_v50  ;;  %v2089_v60 = vmul.f32 %v5233_v45, %v5233_v45 }
 0x7d2   : > { %v2061_v63 = vpop.f32.mrf.mxu0 }
 0x7d3   : > { %2081 = vst [vmem:[#allocation14 + $0x18] sm:$0xff] %v2073_v8  ;;  %v2074_v56 = vadd.f32 %v4128_v14, %v2061_v63  ;;  %2096 = vadd.xlane.f32.xlu0 %v2095_v2  ;;  %v2090_v61 = vmul.f32 %v2073_v8, %v2073_v8 }
 0x7d4   : > { %v2063_v15 = vpop.f32.mrf.mxu0 }
 0x7d5   : > { %2082 = vst [vmem:[#allocation14 + $0x20] sm:$0xff] %v2074_v56  ;;  %v2075_v17 = vadd.f32 %v4129_v16, %v2063_v15  ;;  %v2098_v18 = vadd.f32 %v2090_v61, %v2089_v60  ;;  %v2091_v22 = vmul.f32 %v2074_v56, %v2074_v56 }
 0x7d6   : > { %v2065_v19 = vpop.f32.mrf.mxu0 }
 0x7d7   : > { %2083 = vst [vmem:[#allocation14 + $0x28] sm:$0xff] %v2075_v17  ;;  %v2076_v21 = vadd.f32 %v4130_v20, %v2065_v19  ;;  %2099 = vadd.xlane.f32.xlu1 %v2098_v18  ;;  %v2092_v23 = vmul.f32 %v2075_v17, %v2075_v17 }
 0x7d8   : > { %v2067_v24 = vpop.f32.mrf.mxu0 }
 0x7d9   : > { %2084 = vst [vmem:[#allocation14 + $0x30] sm:$0xff] %v2076_v21  ;;  %v2077_v26 = vadd.f32 %v4131_v25, %v2067_v24  ;;  %v2101_v27 = vadd.f32 %v2092_v23, %v2091_v22  ;;  %v2093_v28 = vmul.f32 %v2076_v21, %v2076_v21 }
 0x7db   : > { %2085 = vst [vmem:[#allocation14 + $0x38] sm:$0xff] %v2077_v26  ;;  %2102 = vadd.xlane.f32.xlu0 %v2101_v27  ;;  %v2094_v29 = vmul.f32 %v2077_v26, %v2077_v26 }
 0x7dd   : > { %v2104_v30 = vadd.f32 %v2094_v29, %v2093_v28 }
 0x7df   : > { %2105 = vadd.xlane.f32.xlu1 %v2104_v30 }
 0x85c   : > { %v2097_v31 = vpop.xlane.xlu0 %2096 }
 0x85d   : > { %v2107_v58 = vmul.f32 0.00390625, %v2097_v31 }
 0x85f   : > { %v2111_v32 = vadd.f32 1e-05, %v2107_v58 }
 0x860   : > { %v2100_v33 = vpop.xlane.xlu1 %2099 }
 0x861   : > { %4116 = vrsqrt.f32 %v2111_v32  ;;  %v2108_v34 = vmul.f32 0.00390625, %v2100_v33 }
 0x863   : > { %v2112_v35 = vadd.f32 1e-05, %v2108_v34 }
 0x864   : > { %v2103_v39 = vpop.xlane.xlu0 %2102 }
 0x865   : > { %4118 = vrsqrt.f32 %v2112_v35  ;;  %v2109_v36 = vmul.f32 0.00390625, %v2103_v39 }
 0x867   : > { %v2113_v37 = vadd.f32 1e-05, %v2109_v36 }
 0x868   : > { %v2106_v38 = vpop.xlane.xlu1 %2105 }
 0x869   : > { %4120 = vrsqrt.f32 %v2113_v37  ;;  %v2110_v40 = vmul.f32 0.00390625, %v2106_v38 }
 0x86b   : > { %v2114_v47 = vadd.f32 1e-05, %v2110_v40 }
 0x86d   : > { %4122 = vrsqrt.f32 %v2114_v47 }
 0x86e   : > { %v4117_v54 = vpop.eup %4116 }
 0x86f   : > { %v2119_v55 = vmul.f32 %v4117_v54, %v5227_v7  ;;  %v2120_v57 = vmul.f32 %v4117_v54, %v5230_v10 }
 0x871   : > { %v2138_v1 = vmul.f32 %v2131_v49, %v2119_v55  ;;  %v2139_v59 = vmul.f32 %v2135_v48, %v2120_v57 }
 0x872   : > { %v4119_v0 = vpop.eup %4118 }
 0x873   : > { %v3645_v62 = vpack.c.bf16 %v2139_v59, %v2138_v1  ;;  %v2121_v3 = vmul.f32 %v4119_v0, %v5233_v45  ;;  %v2122_v4 = vmul.f32 %v4119_v0, %v2073_v8 }
 0x875   : > { %2170 = vst [vmem:[#allocation3 + $0x10] sm:$0xff] %v3645_v62  ;;  %v2140_v5 = vmul.f32 %v2131_v49, %v2121_v3  ;;  %v2141_v13 = vmul.f32 %v2135_v48, %v2122_v4 }
 0x876   : > { %v4121_v43 = vpop.eup %4120 }
 0x877   : > { %v3646_v6 = vpack.c.bf16 %v2141_v13, %v2140_v5  ;;  %v2123_v42 = vmul.f32 %v4121_v43, %v2074_v56  ;;  %v2124_v44 = vmul.f32 %v4121_v43, %v2075_v17 }
 0x879   : > { %2171 = vst [vmem:[#allocation3] sm:$0xff] %v3646_v6  ;;  %v2142_v12 = vmul.f32 %v2131_v49, %v2123_v42  ;;  %v2143_v9 = vmul.f32 %v2135_v48, %v2124_v44 }
 0x87a   : > { %v4123_v7 = vpop.eup %4122 }
 0x87b   : > { %v3647_v11 = vpack.c.bf16 %v2143_v9, %v2142_v12  ;;  %v2125_v10 = vmul.f32 %v4123_v7, %v2076_v21  ;;  %v2126_v46 = vmul.f32 %v4123_v7, %v2077_v26 }
 0x87d   : > { %2172 = vst [vmem:[#allocation3 + $0x18] sm:$0xff] %v3647_v11  ;;  %v2144_v50 = vmul.f32 %v2131_v49, %v2125_v10  ;;  %v2145_v51 = vmul.f32 %v2135_v48, %v2126_v46 }
 0x87f   : > { %v3648_v52 = vpack.c.bf16 %v2145_v51, %v2144_v50 }
 0x881   : > { %2173 = vst [vmem:[#allocation3 + $0x8] sm:$0xff] %v3648_v52 }
 0x882 PF: > { %v4132_v45 = vld [vmem:[%s4867_s20 + $0xe4] ss:$16 sps:$4 sm:$0xff]   ;;  %v4134_v53 = vld [vmem:[%s4867_s20 + $0xe0] ss:$16 sps:$4 sm:$0xff]   ;;  %v4155_v61 = vld [vmem:[%s4867_s20 + $0xec] ss:$16 sps:$4 sm:$0xff]  }
 0x883   : > { %2590 = vmatprep.subr.bf16.mxu0 %v4132_v45  ;;  %v4135_v8 = vld [vmem:[%s4867_s20 + $0xc4] ss:$16 sps:$4 sm:$0xff]   ;;  %v4137_v2 = vld [vmem:[%s4867_s20 + $0xc0] ss:$16 sps:$4 sm:$0xff]   ;;  %v4158_v15 = vld [vmem:[%s4867_s20 + $0xe8] ss:$16 sps:$4 sm:$0xff]   ;;  %2643 = vmatprep.subr.bf16.mxu1 %v4155_v61 }
 0x884   : > { %2591 = vmatpush1.bf16.msra.mxu0 %v4134_v53  ;;  %v4138_v63 = vld [vmem:[%s4867_s20 + $0xa4] ss:$16 sps:$4 sm:$0xff]   ;;  %v4140_v14 = vld [vmem:[%s4867_s20 + $0xa0] ss:$16 sps:$4 sm:$0xff]   ;;  %v4161_v17 = vld [vmem:[%s4867_s20 + $0xcc] ss:$16 sps:$4 sm:$0xff]   ;;  %2644 = vmatpush1.bf16.msra.mxu1 %v4158_v15 }
 0x885   : > { %2592 = vmatprep.subr.bf16.mxu0 %v4135_v8  ;;  %v4141_v56 = vld [vmem:[%s4867_s20 + $0x84] ss:$16 sps:$4 sm:$0xff]   ;;  %v4143_v60 = vld [vmem:[%s4867_s20 + $0x80] ss:$16 sps:$4 sm:$0xff]   ;;  %v4164_v18 = vld [vmem:[%s4867_s20 + $0xc8] ss:$16 sps:$4 sm:$0xff]   ;;  %2645 = vmatprep.subr.bf16.mxu1 %v4161_v17 }
 0x886   : > { %v4144_v16 = vld [vmem:[%s4867_s20 + $0x64] ss:$16 sps:$4 sm:$0xff]   ;;  %v4146_v19 = vld [vmem:[%s4867_s20 + $0x60] ss:$16 sps:$4 sm:$0xff]   ;;  %v4167_v21 = vld [vmem:[%s4867_s20 + $0xac] ss:$16 sps:$4 sm:$0xff]  }
 0x887   : > { %v4147_v20 = vld [vmem:[%s4867_s20 + $0x44] ss:$16 sps:$4 sm:$0xff]   ;;  %v4170_v22 = vld [vmem:[%s4867_s20 + $0xa8] ss:$16 sps:$4 sm:$0xff]   ;;  %v4149_v23 = vld [vmem:[%s4867_s20 + $0x40] ss:$16 sps:$4 sm:$0xff]  }
 0x888   : > { %2593 = vmatpush1.bf16.msra.mxu0 %v4137_v2  ;;  %2646 = vmatpush1.bf16.msra.mxu1 %v4164_v18  ;;  %v4173_v24 = vld [vmem:[%s4867_s20 + $0x8c] ss:$16 sps:$4 sm:$0xff]   ;;  %v4150_v25 = vld [vmem:[%s4867_s20 + $0x24] ss:$16 sps:$4 sm:$0xff]   ;;  %v4152_v26 = vld [vmem:[%s4867_s20 + $0x20] ss:$16 sps:$4 sm:$0xff]  }
 0x889   : > { %2594 = vmatprep.subr.bf16.mxu0 %v4138_v63  ;;  %2647 = vmatprep.subr.bf16.mxu1 %v4167_v21  ;;  %v4176_v27 = vld [vmem:[%s4867_s20 + $0x88] ss:$16 sps:$4 sm:$0xff]   ;;  %v4179_v28 = vld [vmem:[%s4867_s20 + $0x6c] ss:$16 sps:$4 sm:$0xff]   ;;  %v4153_v29 = vld [vmem:[%s4867_s20 + $0x4] ss:$16 sps:$4 sm:$0xff]  }
 0x88a   : > { %v4182_v30 = vld [vmem:[%s4867_s20 + $0x68] ss:$16 sps:$4 sm:$0xff]   ;;  %v4157_v31 = vld [vmem:[%s4867_s20] ss:$16 sps:$4 sm:$0xff]   ;;  %v4185_v58 = vld [vmem:[%s4867_s20 + $0x4c] ss:$16 sps:$4 sm:$0xff]  }
 0x88b   : > { %v4159_v32 = vld [vmem:[%s4867_s20 + $0x1e4] ss:$16 sps:$4 sm:$0xff]   ;;  %v4163_v33 = vld [vmem:[%s4867_s20 + $0x1e0] ss:$16 sps:$4 sm:$0xff]   ;;  %v4188_v34 = vld [vmem:[%s4867_s20 + $0x48] ss:$16 sps:$4 sm:$0xff]  }
 0x88c   : > { %2595 = vmatpush1.bf16.msra.mxu0 %v4140_v14  ;;  %2648 = vmatpush1.bf16.msra.mxu1 %v4170_v22  ;;  %v4191_v35 = vld [vmem:[%s4867_s20 + $0x2c] ss:$16 sps:$4 sm:$0xff]   ;;  %v4165_v39 = vld [vmem:[%s4867_s20 + $0x1c4] ss:$16 sps:$4 sm:$0xff]   ;;  %v4194_v36 = vld [vmem:[%s4867_s20 + $0x28] ss:$16 sps:$4 sm:$0xff]  }
 0x88d   : > { %2596 = vmatprep.subr.bf16.mxu0 %v4141_v56  ;;  %2649 = vmatprep.subr.bf16.mxu1 %v4173_v24  ;;  %v4209_v37 = vld [vmem:[#allocation3 + $0x14] ss:$-16 sps:$4 sm:$0xff]   ;;  %v4169_v38 = vld [vmem:[%s4867_s20 + $0x1c0] ss:$16 sps:$4 sm:$0xff]   ;;  %v4197_v40 = vld [vmem:[%s4867_s20 + $0xc] ss:$16 sps:$4 sm:$0xff]  }
 0x88e   : > { %v4171_v41 = vld [vmem:[%s4867_s20 + $0x1a4] ss:$16 sps:$4 sm:$0xff]   ;;  %2622 = vmatprep.mubr.bf16.mxu0 %v4209_v37  ;;  %2675 = vmatprep.mubr.bf16.mxu1 %v4209_v37  ;;  %v4200_v47 = vld [vmem:[%s4867_s20 + $0x8] ss:$16 sps:$4 sm:$0xff]   ;;  %v4175_v48 = vld [vmem:[%s4867_s20 + $0x1a0] ss:$16 sps:$4 sm:$0xff]  }
 0x88f   : > { %v4203_v49 = vld [vmem:[%s4867_s20 + $0x1ec] ss:$16 sps:$4 sm:$0xff]   ;;  %v4177_v54 = vld [vmem:[%s4867_s20 + $0x184] ss:$16 sps:$4 sm:$0xff]   ;;  %v4206_v55 = vld [vmem:[%s4867_s20 + $0x1e8] ss:$16 sps:$4 sm:$0xff]  }
 0x890   : > { %2597 = vmatpush1.bf16.msra.mxu0 %v4143_v60  ;;  %2650 = vmatpush1.bf16.msra.mxu1 %v4176_v27  ;;  %v4181_v57 = vld [vmem:[%s4867_s20 + $0x180] ss:$16 sps:$4 sm:$0xff]   ;;  %v4210_v1 = vld [vmem:[%s4867_s20 + $0x1cc] ss:$16 sps:$4 sm:$0xff]   ;;  %v4183_v59 = vld [vmem:[%s4867_s20 + $0x164] ss:$16 sps:$4 sm:$0xff]  }
 0x891   : > { %2598 = vmatprep.subr.bf16.mxu0 %v4144_v16  ;;  %2651 = vmatprep.subr.bf16.mxu1 %v4179_v28  ;;  %v4212_v0 = vld [vmem:[%s4867_s20 + $0x1c8] ss:$16 sps:$4 sm:$0xff]   ;;  %v4187_v62 = vld [vmem:[%s4867_s20 + $0x160] ss:$16 sps:$4 sm:$0xff]   ;;  %v4213_v3 = vld [vmem:[%s4867_s20 + $0x1ac] ss:$16 sps:$4 sm:$0xff]  }
 0x892   : > { %v4189_v4 = vld [vmem:[%s4867_s20 + $0x144] ss:$16 sps:$4 sm:$0xff]   ;;  %v4193_v5 = vld [vmem:[%s4867_s20 + $0x140] ss:$16 sps:$4 sm:$0xff]   ;;  %v4215_v13 = vld [vmem:[%s4867_s20 + $0x1a8] ss:$16 sps:$4 sm:$0xff]  }
 0x893   : > { %v4195_v43 = vld [vmem:[%s4867_s20 + $0x124] ss:$16 sps:$4 sm:$0xff]   ;;  %v4219_v6 = vld [vmem:[%s4867_s20 + $0x18c] ss:$16 sps:$4 sm:$0xff]   ;;  %v4221_v42 = vld [vmem:[%s4867_s20 + $0x188] ss:$16 sps:$4 sm:$0xff]  }
 0x894   : > { %2599 = vmatpush1.bf16.msra.mxu0 %v4146_v19  ;;  %2652 = vmatpush1.bf16.msra.mxu1 %v4182_v30  ;;  %v4199_v44 = vld [vmem:[%s4867_s20 + $0x120] ss:$16 sps:$4 sm:$0xff]   ;;  %v4222_v12 = vld [vmem:[%s4867_s20 + $0x16c] ss:$16 sps:$4 sm:$0xff]   ;;  %v4201_v9 = vld [vmem:[%s4867_s20 + $0x104] ss:$16 sps:$4 sm:$0xff]  }
 0x895   : > { %2600 = vmatprep.subr.bf16.mxu0 %v4147_v20  ;;  %2653 = vmatprep.subr.bf16.mxu1 %v4185_v58  ;;  %v4224_v7 = vld [vmem:[%s4867_s20 + $0x168] ss:$16 sps:$4 sm:$0xff]   ;;  %v4205_v11 = vld [vmem:[%s4867_s20 + $0x100] ss:$16 sps:$4 sm:$0xff]   ;;  %v4225_v10 = vld [vmem:[%s4867_s20 + $0x14c] ss:$16 sps:$4 sm:$0xff]  }
 0x896   : > { %v4236_v46 = vld [vmem:[%s4873_s11 + $0x74] ss:$8 sps:$4 sm:$0xff]   ;;  %v4207_v50 = vld [vmem:[#allocation3 + $0x10] ss:$-16 sps:$4 sm:$0xff]   ;;  %v4227_v51 = vld [vmem:[%s4867_s20 + $0x148] ss:$16 sps:$4 sm:$0xff]  }
 0x897   : > { %v4216_v52 = vld [vmem:[#allocation3 + $0x1c] ss:$-16 sps:$4 sm:$0xff]   ;;  %v4234_v53 = vld [vmem:[%s4873_s11 + $0x70] ss:$8 sps:$4 sm:$0xff]   ;;  %v4237_v14 = vld [vmem:[%s4873_s11 + $0x60] ss:$8 sps:$4 sm:$0xff]  }
 0x898   : > { %2601 = vmatpush1.bf16.msra.mxu0 %v4149_v23  ;;  %2654 = vmatpush1.bf16.msra.mxu1 %v4188_v34  ;;  %v4228_v45 = vld [vmem:[%s4867_s20 + $0x12c] ss:$16 sps:$4 sm:$0xff]   ;;  %v4230_v2 = vld [vmem:[%s4867_s20 + $0x128] ss:$16 sps:$4 sm:$0xff]   ;;  %s5465_s25 = sld [smem:[#allocation26_spill]] }
 0x899   : > { %2602 = vmatprep.subr.bf16.mxu0 %v4150_v25  ;;  %2655 = vmatprep.subr.bf16.mxu1 %v4191_v35  ;;  %v4239_v8 = vld [vmem:[%s4873_s11 + $0x64] ss:$8 sps:$4 sm:$0xff]   ;;  %v4242_v56 = vld [vmem:[%s4873_s11 + $0x54] ss:$8 sps:$4 sm:$0xff]   ;;  %v4218_v60 = vld [vmem:[#allocation3 + $0x18] ss:$-16 sps:$4 sm:$0xff]  }
 0x89a   : > { %v4231_v63 = vld [vmem:[%s4867_s20 + $0x10c] ss:$16 sps:$4 sm:$0xff]   ;;  %v4233_v61 = vld [vmem:[%s4867_s20 + $0x108] ss:$16 sps:$4 sm:$0xff]  }
 0x89b   : > { %v4240_v15 = vld [vmem:[%s4873_s11 + $0x50] ss:$8 sps:$4 sm:$0xff]   ;;  %v4245_v16 = vld [vmem:[%s4873_s11 + $0x44] ss:$8 sps:$4 sm:$0xff]   ;;  %v4243_v17 = vld [vmem:[%s4873_s11 + $0x40] ss:$8 sps:$4 sm:$0xff]  }
 0x89c   : > { %2603 = vmatpush1.bf16.msra.mxu0 %v4152_v26  ;;  %2656 = vmatpush1.bf16.msra.mxu1 %v4194_v36  ;;  %v4248_v18 = vld [vmem:[%s4873_s11 + $0x34] ss:$8 sps:$4 sm:$0xff]   ;;  %v4246_v19 = vld [vmem:[%s4873_s11 + $0x30] ss:$8 sps:$4 sm:$0xff]   ;;  %v4251_v20 = vld [vmem:[%s4873_s11 + $0x24] ss:$8 sps:$4 sm:$0xff]  }
 0x89d   : > { %2604 = vmatprep.subr.bf16.mxu0 %v4153_v29  ;;  %2657 = vmatprep.subr.bf16.mxu1 %v4197_v40  ;;  %v4249_v21 = vld [vmem:[%s4873_s11 + $0x20] ss:$8 sps:$4 sm:$0xff]   ;;  %v4254_v22 = vld [vmem:[%s4873_s11 + $0x14] ss:$8 sps:$4 sm:$0xff]   ;;  %v4252_v23 = vld [vmem:[%s4873_s11 + $0x10] ss:$8 sps:$4 sm:$0xff]  }
 0x89e   : > { %v4257_v24 = vld [vmem:[%s4873_s11 + $0x4] ss:$8 sps:$4 sm:$0xff]   ;;  %v4255_v25 = vld [vmem:[%s4873_s11] ss:$8 sps:$4 sm:$0xff]   ;;  %v4260_v26 = vld [vmem:[%s4873_s11 + $0xf4] ss:$8 sps:$4 sm:$0xff]  }
 0x89f   : > { %v4258_v27 = vld [vmem:[%s4873_s11 + $0xf0] ss:$8 sps:$4 sm:$0xff]   ;;  %v4263_v28 = vld [vmem:[%s4873_s11 + $0xe4] ss:$8 sps:$4 sm:$0xff]   ;;  %v4261_v29 = vld [vmem:[%s4873_s11 + $0xe0] ss:$8 sps:$4 sm:$0xff]  }
 0x8a0   : > { %2605 = vmatpush1.bf16.msra.mxu0 %v4157_v31  ;;  %2658 = vmatpush1.bf16.msra.mxu1 %v4200_v47  ;;  %v4266_v30 = vld [vmem:[%s4873_s11 + $0xd4] ss:$8 sps:$4 sm:$0xff]   ;;  %v4264_v31 = vld [vmem:[%s4873_s11 + $0xd0] ss:$8 sps:$4 sm:$0xff]   ;;  %v4269_v58 = vld [vmem:[%s4873_s11 + $0xc4] ss:$8 sps:$4 sm:$0xff]  }
 0x8a1   : > { %2606 = vmatprep.subr.bf16.mxu0 %v4159_v32  ;;  %2659 = vmatprep.subr.bf16.mxu1 %v4203_v49  ;;  %v4267_v32 = vld [vmem:[%s4873_s11 + $0xc0] ss:$8 sps:$4 sm:$0xff]   ;;  %v4270_v34 = vld [vmem:[%s4873_s11 + $0xb0] ss:$8 sps:$4 sm:$0xff]   ;;  %v4275_v35 = vld [vmem:[%s4873_s11 + $0xa4] ss:$8 sps:$4 sm:$0xff]  }
 0x8a2   : > { %v4278_v36 = vld [vmem:[%s4873_s11 + $0x94] ss:$8 sps:$4 sm:$0xff]   ;;  %v4276_v37 = vld [vmem:[%s4873_s11 + $0x90] ss:$8 sps:$4 sm:$0xff]   ;;  %v4279_v40 = vld [vmem:[%s4873_s11 + $0x80] ss:$8 sps:$4 sm:$0xff]  }
 0x8a3   : > { %p3033_p0 = scmp.eq.s32.totalorder %s5465_s25, 1 }
 0x8a4   : > { %2607 = vmatpush2.bf16.msra.mxu0 %v4163_v33  ;;  %2660 = vmatpush2.bf16.msra.mxu1 %v4206_v55  ;;  %v4272_v33 = vld [vmem:[%s4873_s11 + $0xb4] ss:$8 sps:$4 sm:$0xff]  }
 0x8a5   : > { %2608 = vmatprep.subr.bf16.mxu0 %v4165_v39  ;;  %2661 = vmatprep.subr.bf16.mxu1 %v4210_v1  ;;  %v4273_v39 = vld [vmem:[%s4873_s11 + $0xa0] ss:$8 sps:$4 sm:$0xff]   ;;  %p5355_p11 = pnand %p3033_p0, %p461_p5 }
 0x8a8   : > { %2609 = vmatpush2.bf16.msra.mxu0 %v4169_v38  ;;  %2662 = vmatpush2.bf16.msra.mxu1 %v4212_v0  ;;  %v4281_v38 = vld [vmem:[%s4873_s11 + $0x84] ss:$8 sps:$4 sm:$0xff]  }
 0x8a9   : > { %2610 = vmatprep.subr.bf16.mxu0 %v4171_v41  ;;  %2663 = vmatprep.subr.bf16.mxu1 %v4213_v3 }
 0x8ac   : > { %2611 = vmatpush2.bf16.msra.mxu0 %v4175_v48  ;;  %2664 = vmatpush2.bf16.msra.mxu1 %v4215_v13 }
 0x8ad   : > { %2612 = vmatprep.subr.bf16.mxu0 %v4177_v54  ;;  %2665 = vmatprep.subr.bf16.mxu1 %v4219_v6 }
 0x8b0   : > { %2613 = vmatpush2.bf16.msra.mxu0 %v4181_v57  ;;  %2666 = vmatpush2.bf16.msra.mxu1 %v4221_v42 }
 0x8b1   : > { %2614 = vmatprep.subr.bf16.mxu0 %v4183_v59  ;;  %2667 = vmatprep.subr.bf16.mxu1 %v4222_v12 }
 0x8b4   : > { %2615 = vmatpush2.bf16.msra.mxu0 %v4187_v62  ;;  %2668 = vmatpush2.bf16.msra.mxu1 %v4224_v7 }
 0x8b5   : > { %2616 = vmatprep.subr.bf16.mxu0 %v4189_v4  ;;  %2669 = vmatprep.subr.bf16.mxu1 %v4225_v10 }
 0x8b8   : > { %2617 = vmatpush2.bf16.msra.mxu0 %v4193_v5  ;;  %2670 = vmatpush2.bf16.msra.mxu1 %v4227_v51 }
 0x8b9   : > { %2618 = vmatprep.subr.bf16.mxu0 %v4195_v43  ;;  %2671 = vmatprep.subr.bf16.mxu1 %v4228_v45 }
 0x8bc   : > { %2619 = vmatpush2.bf16.msra.mxu0 %v4199_v44  ;;  %2672 = vmatpush2.bf16.msra.mxu1 %v4230_v2 }
 0x8bd   : > { %2620 = vmatprep.subr.bf16.mxu0 %v4201_v9  ;;  %2673 = vmatprep.subr.bf16.mxu1 %v4231_v63 }
 0x8c0   : > { %2621 = vmatpush2.bf16.msra.mxu0 %v4205_v11  ;;  %2674 = vmatpush2.bf16.msra.mxu1 %v4233_v61 }
 0x8c1   : > { %2964 = vmatprep.subr.bf16.mxu0 %v4236_v46  ;;  %3713 = vmatprep.subr.bf16.mxu1 %v4236_v46 }
 0x8c3   : > { %2623 = vmatmul.mubr.bf16.vlgmr.msra.gmra.mxu0 %v4207_v50  ;;  %2676 = vmatmul.mubr.bf16.vlgmr.msra.gmra.mxu1 %v4207_v50 }
 0x8c4   : > { %2632 = vmatprep.mubr.bf16.mxu0 %v4216_v52  ;;  %2965 = vmatpush1.bf16.msra.mxu0 %v4234_v53 }
 0x8c5   : > { %2966 = vmatprep.subr.bf16.mxu0 %v4239_v8  ;;  %2685 = vmatprep.mubr.bf16.mxu1 %v4216_v52 }
 0x8c6   : > { %3729 = vmatpush1.bf16.msra.mxu1 %v4234_v53 }
 0x8c7   : > { %3714 = vmatprep.subr.bf16.mxu1 %v4239_v8 }
 0x8c8   : > { %2967 = vmatpush1.bf16.msra.mxu0 %v4237_v14 }
 0x8c9   : > { %2968 = vmatprep.subr.bf16.mxu0 %v4242_v56 }
 0x8ca   : > { %3730 = vmatpush1.bf16.msra.mxu1 %v4237_v14 }
 0x8cb   : > { %2633 = vmatmul.mubr.bf16.gmra.mxu0 %v4218_v60  ;;  %3715 = vmatprep.subr.bf16.mxu1 %v4242_v56 }
 0x8cc   : > { %2969 = vmatpush1.bf16.msra.mxu0 %v4240_v15  ;;  %2686 = vmatmul.mubr.bf16.gmra.mxu1 %v4218_v60 }
 0x8cd   : > { %2970 = vmatprep.subr.bf16.mxu0 %v4245_v16 }
 0x8ce   : > { %3731 = vmatpush1.bf16.msra.mxu1 %v4240_v15 }
 0x8cf   : > { %3716 = vmatprep.subr.bf16.mxu1 %v4245_v16 }
 0x8d0   : > { %2971 = vmatpush1.bf16.msra.mxu0 %v4243_v17 }
 0x8d1   : > { %2972 = vmatprep.subr.bf16.mxu0 %v4248_v18 }
 0x8d2   : > { %3732 = vmatpush1.bf16.msra.mxu1 %v4243_v17 }
 0x8d3   : > { %3717 = vmatprep.subr.bf16.mxu1 %v4248_v18 }
 0x8d4   : > { %2973 = vmatpush1.bf16.msra.mxu0 %v4246_v19 }
 0x8d5   : > { %2974 = vmatprep.subr.bf16.mxu0 %v4251_v20 }
 0x8d6   : > { %3733 = vmatpush1.bf16.msra.mxu1 %v4246_v19 }
 0x8d7   : > { %3718 = vmatprep.subr.bf16.mxu1 %v4251_v20 }
 0x8d8   : > { %2975 = vmatpush1.bf16.msra.mxu0 %v4249_v21 }
 0x8d9   : > { %2976 = vmatprep.subr.bf16.mxu0 %v4254_v22 }
 0x8da   : > { %3734 = vmatpush1.bf16.msra.mxu1 %v4249_v21 }
 0x8db   : > { %3719 = vmatprep.subr.bf16.mxu1 %v4254_v22 }
 0x8dc   : > { %2977 = vmatpush1.bf16.msra.mxu0 %v4252_v23 }
 0x8dd   : > { %2978 = vmatprep.subr.bf16.mxu0 %v4257_v24 }
 0x8de   : > { %3735 = vmatpush1.bf16.msra.mxu1 %v4252_v23 }
 0x8df   : > { %3720 = vmatprep.subr.bf16.mxu1 %v4257_v24 }
 0x8e0   : > { %2979 = vmatpush1.bf16.msra.mxu0 %v4255_v25 }
 0x8e1   : > { %2980 = vmatprep.subr.bf16.mxu0 %v4260_v26 }
 0x8e2   : > { %3736 = vmatpush1.bf16.msra.mxu1 %v4255_v25 }
 0x8e3   : > { %3721 = vmatprep.subr.bf16.mxu1 %v4260_v26 }
 0x8e4   : > { %2981 = vmatpush2.bf16.msra.mxu0 %v4258_v27 }
 0x8e5   : > { %2982 = vmatprep.subr.bf16.mxu0 %v4263_v28 }
 0x8e6   : > { %3737 = vmatpush2.bf16.msra.mxu1 %v4258_v27 }
 0x8e7   : > { %3722 = vmatprep.subr.bf16.mxu1 %v4263_v28 }
 0x8e8   : > { %2983 = vmatpush2.bf16.msra.mxu0 %v4261_v29 }
 0x8e9   : > { %2984 = vmatprep.subr.bf16.mxu0 %v4266_v30 }
 0x8ea   : > { %3738 = vmatpush2.bf16.msra.mxu1 %v4261_v29 }
 0x8eb   : > { %3723 = vmatprep.subr.bf16.mxu1 %v4266_v30 }
 0x8ec   : > { %2985 = vmatpush2.bf16.msra.mxu0 %v4264_v31 }
 0x8ed   : > { %2986 = vmatprep.subr.bf16.mxu0 %v4269_v58 }
 0x8ee   : > { %3739 = vmatpush2.bf16.msra.mxu1 %v4264_v31 }
 0x8ef   : > { %3724 = vmatprep.subr.bf16.mxu1 %v4269_v58 }
 0x8f0   : > { %2987 = vmatpush2.bf16.msra.mxu0 %v4267_v32 }
 0x8f1   : > { %2988 = vmatprep.subr.bf16.mxu0 %v4272_v33 }
 0x8f2   : > { %3740 = vmatpush2.bf16.msra.mxu1 %v4267_v32 }
 0x8f3   : > { %3725 = vmatprep.subr.bf16.mxu1 %v4272_v33 }
 0x8f4   : > { %2989 = vmatpush2.bf16.msra.mxu0 %v4270_v34 }
 0x8f5   : > { %2990 = vmatprep.subr.bf16.mxu0 %v4275_v35 }
 0x8f6   : > { %3741 = vmatpush2.bf16.msra.mxu1 %v4270_v34 }
 0x8f7   : > { %3726 = vmatprep.subr.bf16.mxu1 %v4275_v35 }
 0x8f8   : > { %2991 = vmatpush2.bf16.msra.mxu0 %v4273_v39 }
 0x8f9   : > { %2992 = vmatprep.subr.bf16.mxu0 %v4278_v36 }
 0x8fa   : > { %3742 = vmatpush2.bf16.msra.mxu1 %v4273_v39 }
 0x8fb   : > { %3727 = vmatprep.subr.bf16.mxu1 %v4278_v36 }
 0x8fc   : > { %2993 = vmatpush2.bf16.msra.mxu0 %v4276_v37 }
 0x8fd   : > { %2994 = vmatprep.subr.bf16.mxu0 %v4281_v38 }
 0x8fe   : > { %3743 = vmatpush2.bf16.msra.mxu1 %v4276_v37 }
 0x8ff   : > { %3728 = vmatprep.subr.bf16.mxu1 %v4281_v38 }
 0x900   : > { %2995 = vmatpush2.bf16.msra.mxu0 %v4279_v40 }
 0x902   : > { %3744 = vmatpush2.bf16.msra.mxu1 %v4279_v40 }
 0x983   : > { %v2624_v41 = vpop.f32.mrf.mxu0  ;;  %v2677_v7 = vpop.f32.mrf.mxu1 }
 0x984   : > { %v3591_v47 = vmul.f32 -1.442695, %v2624_v41 }
 0x985   : > { %v2626_v48 = vpop.f32.mrf.mxu0  ;;  %v2679_v51 = vpop.f32.mrf.mxu1 }
 0x986   : > { %4282 = vpow2.f32 %v3591_v47  ;;  %v3592_v49 = vmul.f32 -1.442695, %v2626_v48 }
 0x987   : > { %v2628_v54 = vpop.f32.mrf.mxu0  ;;  %v2681_v2 = vpop.f32.mrf.mxu1 }
 0x988   : > { %4284 = vpow2.f32 %v3592_v49  ;;  %v3593_v55 = vmul.f32 -1.442695, %v2628_v54 }
 0x989   : > { %v2630_v57 = vpop.f32.mrf.mxu0  ;;  %v2683_v60 = vpop.f32.mrf.mxu1 }
 0x98a   : > { %4286 = vpow2.f32 %v3593_v55  ;;  %v3594_v1 = vmul.f32 -1.442695, %v2630_v57 }
 0x98b   : > { %v5346_v59 = vpop.f32.mrf.mxu0 }
 0x98c   : > { %4288 = vpow2.f32 %v3594_v1  ;;  %v3595_v0 = vmul.f32 -1.442695, %v5346_v59  ;;  %v2687_v17 = vpop.f32.mrf.mxu1 }
 0x98d   : > { %v2636_v62 = vpop.f32.mrf.mxu0 }
 0x98e   : > { %4290 = vpow2.f32 %v3595_v0  ;;  %v3596_v3 = vmul.f32 -1.442695, %v2636_v62  ;;  %v2689_v24 = vpop.f32.mrf.mxu1  ;;  %v2762_v0 = vld [vmem:[#allocation4 + $0x8] sm:$0xff] }
 0x98f   : > { %v2638_v4 = vpop.f32.mrf.mxu0 }
 0x990   : > { %4292 = vpow2.f32 %v3596_v3  ;;  %v3597_v5 = vmul.f32 -1.442695, %v2638_v4  ;;  %v2691_v32 = vpop.f32.mrf.mxu1 }
 0x991   : > { %v2640_v13 = vpop.f32.mrf.mxu0 }
 0x992   : > { %4294 = vpow2.f32 %v3597_v5  ;;  %v3598_v43 = vmul.f32 -1.442695, %v2640_v13  ;;  %v2693_v38 = vpop.f32.mrf.mxu1 }
 0x993   : > { %v4283_v6 = vpop.eup %4282 }
 0x994   : > { %4296 = vpow2.f32 %v3598_v43  ;;  %v2720_v44 = vadd.f32 1.0, %v4283_v6  ;;  %v2764_v43 = vld [vmem:[#allocation4 + $0x20] sm:$0xff] }
 0x995   : > { %v4285_v42 = vpop.eup %4284 }
 0x996   : > { %v2721_v12 = vadd.f32 1.0, %v4285_v42 }
 0x997   : > { %v4287_v9 = vpop.eup %4286 }
 0x998   : > { %4298 = vrcp.f32 %v2721_v12  ;;  %v2722_v11 = vadd.f32 1.0, %v4287_v9 }
 0x999   : > { %v4289_v10 = vpop.eup %4288  ;;  %4300 = vrcp.f32 %v2720_v44  ;;  %v2765_v44 = vld [vmem:[#allocation4 + $0x10] sm:$0xff] }
 0x99a   : > { %4302 = vrcp.f32 %v2722_v11  ;;  %v2723_v46 = vadd.f32 1.0, %v4289_v10 }
 0x99b   : > { %v4291_v50 = vpop.eup %4290 }
 0x99c   : > { %4304 = vrcp.f32 %v2723_v46  ;;  %v2724_v45 = vadd.f32 1.0, %v4291_v50  ;;  %v2767_v46 = vld [vmem:[#allocation4 + $0x28] sm:$0xff] }
 0x99d   : > { %v4293_v52 = vpop.eup %4292 }
 0x99e   : > { %v2725_v53 = vadd.f32 1.0, %v4293_v52 }
 0x99f   : > { %v4295_v8 = vpop.eup %4294 }
 0x9a0   : > { %4306 = vrcp.f32 %v2725_v53  ;;  %v2726_v63 = vadd.f32 1.0, %v4295_v8 }
 0x9a1   : > { %v4297_v14 = vpop.eup %4296  ;;  %4308 = vrcp.f32 %v2724_v45 }
 0x9a2   : > { %4310 = vrcp.f32 %v2726_v63  ;;  %v2727_v56 = vadd.f32 1.0, %v4297_v14 }
 0x9a4   : > { %4312 = vrcp.f32 %v2727_v56 }
 0x9a5   : > { %v4299_v61 = vpop.eup %4298 }
 0x9a6   : > { %v4301_v15 = vpop.eup %4300  ;;  %v2745_v18 = vmul.f32 %v4299_v61, %v2626_v48 }
 0x9a7   : > { %v4303_v16 = vpop.eup %4302  ;;  %v2744_v21 = vmul.f32 %v4301_v15, %v2624_v41 }
 0x9a8   : > { %v2746_v19 = vmul.f32 %v4303_v16, %v2628_v54  ;;  %v2753_v25 = vmul.f32 %v2745_v18, %v2679_v51  ;;  %v2760_v54 = vld [vmem:[#allocation4] sm:$0xff] }
 0x9a9   : > { %v4305_v20 = vpop.eup %4304  ;;  %v2752_v28 = vmul.f32 %v2744_v21, %v2677_v7  ;;  %v2766_v7 = vld [vmem:[#allocation4 + $0x30] sm:$0xff] }
 0x9aa   : > { %v2747_v22 = vmul.f32 %v4305_v20, %v2630_v57  ;;  %v2754_v23 = vmul.f32 %v2746_v19, %v2681_v2  ;;  %v2761_v57 = vld [vmem:[#allocation4 + $0x38] sm:$0xff] }
 0x9ac   : > { %v2755_v26 = vmul.f32 %v2747_v22, %v2683_v60  ;;  %v2768_v58 = vpack.c.bf16 %v2754_v23, %v2752_v28 }
 0x9ad   : > { %v4307_v27 = vpop.eup %4306 }
 0x9ae   : > { %v4309_v29 = vpop.eup %4308  ;;  %v2769_v30 = vpack.c.bf16 %v2755_v26, %v2753_v25  ;;  %v2749_v33 = vmul.f32 %v4307_v27, %v2636_v62 }
 0x9af   : > { %v4311_v31 = vpop.eup %4310  ;;  %v2748_v39 = vmul.f32 %v4309_v29, %v5346_v59 }
 0x9b0   : > { %v2750_v34 = vmul.f32 %v4311_v31, %v2638_v4  ;;  %2996 = vmatprep.mubr.bf16.mxu0 %v2769_v30  ;;  %v2757_v40 = vmul.f32 %v2749_v33, %v2689_v24  ;;  %v2763_v4 = vld [vmem:[#allocation4 + $0x18] sm:$0xff] }
 0x9b1   : > { %v4313_v35 = vpop.eup %4312  ;;  %2997 = vmatmul.mubr.bf16.vlgmr.msra.gmra.mxu0 %v2768_v58  ;;  %v2756_v47 = vmul.f32 %v2748_v39, %v2687_v17 }
 0x9b2   : > { %v2751_v36 = vmul.f32 %v4313_v35, %v2640_v13  ;;  %v2758_v37 = vmul.f32 %v2750_v34, %v2691_v32 }
 0x9b4   : > { %v2759_v41 = vmul.f32 %v2751_v36, %v2693_v38  ;;  %v2770_v49 = vpack.c.bf16 %v2758_v37, %v2756_v47 }
 0x9b6   : > { %v2771_v48 = vpack.c.bf16 %v2759_v41, %v2757_v40 }
 0x9b8   : > { %3006 = vmatprep.mubr.bf16.mxu1 %v2771_v48 }
 0x9b9   : > { %3007 = vmatmul.mubr.bf16.vlgmr.msra.gmra.mxu1 %v2770_v49 }
 0xa71   : > { %v2998_v55 = vpop.f32.mrf.mxu0 }
 0xa72   : > { %v3017_v1 = vadd.f32 %v2998_v55, %v2760_v54 }
 0xa73   : > { %v3000_v59 = vpop.f32.mrf.mxu0 }
 0xa74   : > { %3025 = vst [vmem:[#allocation4] sm:$0xff] %v3017_v1  ;;  %v3018_v62 = vadd.f32 %v3000_v59, %v2761_v57 }
 0xa75   : > { %v3002_v3 = vpop.f32.mrf.mxu0 }
 0xa76   : > { %3026 = vst [vmem:[#allocation4 + $0x38] sm:$0xff] %v3018_v62  ;;  %v3019_v5 = vadd.f32 %v3002_v3, %v2762_v0 }
 0xa77   : > { %v3004_v13 = vpop.f32.mrf.mxu0 }
 0xa78   : > { %3027 = vst [vmem:[#allocation4 + $0x8] sm:$0xff] %v3019_v5  ;;  %v3020_v6 = vadd.f32 %v3004_v13, %v2763_v4 }
 0xa79   : > { %v3008_v42 = vpop.f32.mrf.mxu1 }
 0xa7a   : > { %3028 = vst [vmem:[#allocation4 + $0x18] sm:$0xff] %v3020_v6  ;;  %v3021_v12 = vadd.f32 %v3008_v42, %v2764_v43 }
 0xa7b   : > { %v3010_v9 = vpop.f32.mrf.mxu1 }
 0xa7c   : > { %3029 = vst [vmem:[#allocation4 + $0x20] sm:$0xff] %v3021_v12  ;;  %v3022_v11 = vadd.f32 %v3010_v9, %v2765_v44 }
 0xa7d   : > { %v3012_v10 = vpop.f32.mrf.mxu1 }
 0xa7e   : > { %3030 = vst [vmem:[#allocation4 + $0x10] sm:$0xff] %v3022_v11  ;;  %v3023_v50 = vadd.f32 %v3012_v10, %v2766_v7  ;;  %3038 = sbr.rel (%p5355_p11) target bundleno = 2701 (0xa8d), region = 80 }
 0xa7f   : > { %v3014_v51 = vpop.f32.mrf.mxu1 }
 0xa80   : > { %3031 = vst [vmem:[#allocation4 + $0x30] sm:$0xff] %v3023_v50  ;;  %v3024_v52 = vadd.f32 %v3014_v51, %v2767_v46 }
 0xa82   : > { %3032 = vst [vmem:[#allocation4 + $0x28] sm:$0xff] %v3024_v52 }
 0xa83   : > { %v3039_v45 = vld [vmem:[#allocation14] sm:$0xff]  ;;  %v3040_v8 = vld [vmem:[#allocation14 + $0x8] sm:$0xff]  ;;  %v3048_v63 = vld [vmem:[#allocation4 + $0x38] sm:$0xff] }
 0xa84   : > { %v3047_v53 = vld [vmem:[#allocation4] sm:$0xff]  ;;  %v3041_v14 = vld [vmem:[#allocation14 + $0x10] sm:$0xff]  ;;  %v3049_v56 = vld [vmem:[#allocation4 + $0x8] sm:$0xff]  ;;  %v3056_v60 = vadd.f32 %v3048_v63, %v3040_v8 }
 0xa85   : > { %v3055_v2 = vadd.f32 %v3047_v53, %v3039_v45  ;;  %v3057_v61 = vadd.f32 %v3049_v56, %v3041_v14  ;;  %v3042_v15 = vld [vmem:[#allocation14 + $0x18] sm:$0xff]  ;;  %v3043_v17 = vld [vmem:[#allocation14 + $0x20] sm:$0xff]  ;;  %v3044_v20 = vld [vmem:[#allocation14 + $0x28] sm:$0xff] }
 0xa86   : > { %v3050_v16 = vld [vmem:[#allocation4 + $0x18] sm:$0xff]  ;;  %v3051_v19 = vld [vmem:[#allocation4 + $0x20] sm:$0xff]  ;;  %v3052_v21 = vld [vmem:[#allocation4 + $0x10] sm:$0xff]  ;;  %3064 = vst [vmem:[#allocation14 + $0x8] sm:$0xff] %v3056_v60 }
 0xa87   : > { %3063 = vst [vmem:[#allocation14] sm:$0xff] %v3055_v2  ;;  %v3058_v18 = vadd.f32 %v3050_v16, %v3042_v15  ;;  %3065 = vst [vmem:[#allocation14 + $0x10] sm:$0xff] %v3057_v61  ;;  %v3059_v22 = vadd.f32 %v3051_v19, %v3043_v17  ;;  %v3060_v23 = vadd.f32 %v3052_v21, %v3044_v20  ;;  %v3045_v24 = vld [vmem:[#allocation14 + $0x30] sm:$0xff]  ;;  %v3046_v26 = vld [vmem:[#allocation14 + $0x38] sm:$0xff] }
 0xa88   : > { %v3053_v25 = vld [vmem:[#allocation4 + $0x30] sm:$0xff] }
 0xa89   : > { %3066 = vst [vmem:[#allocation14 + $0x18] sm:$0xff] %v3058_v18  ;;  %v3061_v27 = vadd.f32 %v3053_v25, %v3045_v24  ;;  %v3054_v28 = vld [vmem:[#allocation4 + $0x28] sm:$0xff]  ;;  %3067 = vst [vmem:[#allocation14 + $0x20] sm:$0xff] %v3059_v22 }
 0xa8a   : > { %3068 = vst [vmem:[#allocation14 + $0x28] sm:$0xff] %v3060_v23  ;;  %v3062_v29 = vadd.f32 %v3054_v28, %v3046_v26 }
 0xa8b   : > { %3069 = vst [vmem:[#allocation14 + $0x30] sm:$0xff] %v3061_v27 }
 0xa8c   : > { %3070 = vst [vmem:[#allocation14 + $0x38] sm:$0xff] %v3062_v29 }
 0xa8d PF: > { %s5468_s11 = sld [smem:[#allocation27_spill]] }
 0xa93   : > { %p3071_p5 = scmp.eq.s32.totalorder %s5468_s11, 1 }
 0xa95   : > { %p3072_p3 = pnand %p3071_p5, %p3033_p0 }
 0xa96   : > { %s5470_s23 = sld [smem:[#allocation37_spill]] (!%p3072_p3) }
 0xa97   : > { %3075 = sbr.rel (%p3072_p3) target bundleno = 2891 (0xb4b), region = 84 }
 0xa9c   : > { %v3080_v30 = vld [vmem:[#allocation14 + $0x20] sm:$0xff]  ;;  %v3081_v31 = vld [vmem:[#allocation14 + $0x28] sm:$0xff]  ;;  %v3089_v32 = vld [vmem:[#allocation4 + $0x10] sm:$0xff]  ;;  %v3143_v2 = vlaneseq }
 0xa9d   : > { %v3088_v58 = vld [vmem:[#allocation4 + $0x20] sm:$0xff]  ;;  %v3077_v35 = vld [vmem:[#allocation14 + $0x8] sm:$0xff]  ;;  %v3097_v39 = vadd.f32 %v3089_v32, %v3081_v31  ;;  %v3085_v37 = vld [vmem:[#allocation4 + $0x38] sm:$0xff] }
 0xa9e   : > { %v3096_v33 = vadd.f32 %v3088_v58, %v3080_v30  ;;  %v3076_v34 = vld [vmem:[#allocation14] sm:$0xff]  ;;  %v3082_v38 = vld [vmem:[#allocation14 + $0x30] sm:$0xff]  ;;  %v3093_v47 = vadd.f32 %v3085_v37, %v3077_v35  ;;  %v3083_v48 = vld [vmem:[#allocation14 + $0x38] sm:$0xff]  ;;  %v3144_v15 = vshrl.u32 %v3143_v2, 7 }
 0xa9f   : > { %v3084_v36 = vld [vmem:[#allocation4] sm:$0xff]  ;;  %v3090_v49 = vld [vmem:[#allocation4 + $0x30] sm:$0xff]  ;;  %v3091_v54 = vld [vmem:[#allocation4 + $0x28] sm:$0xff]  ;;  %v3106_v55 = vmul.f32 %v3097_v39, %v3097_v39 }
 0xaa0   : > { %v3105_v40 = vmul.f32 %v3096_v33, %v3096_v33  ;;  %v3092_v41 = vadd.f32 %v3084_v36, %v3076_v34  ;;  %v3098_v57 = vadd.f32 %v3090_v49, %v3082_v38  ;;  %v3099_v1 = vadd.f32 %v3091_v54, %v3083_v48  ;;  %v3078_v59 = vld [vmem:[#allocation14 + $0x10] sm:$0xff]  ;;  %v3079_v0 = vld [vmem:[#allocation14 + $0x18] sm:$0xff]  ;;  %v3086_v62 = vld [vmem:[#allocation4 + $0x8] sm:$0xff] }
 0xaa1   : > { %v3102_v4 = vmul.f32 %v3093_v47, %v3093_v47  ;;  %v3087_v5 = vld [vmem:[#allocation4 + $0x18] sm:$0xff]  ;;  %v3094_v13 = vadd.f32 %v3086_v62, %v3078_v59  ;;  %v3145_v16 = vsub.s32 0, %v3144_v15  ;;  %v3149_v17 = vsub.s32 1, %v3144_v15  ;;  %v3100_v18 = vld [vmem:[%s5470_s23] sm:$0x3] }
 0xaa2   : > { %v3101_v3 = vmul.f32 %v3092_v41, %v3092_v41  ;;  %v3115_v43 = vadd.f32 %v3106_v55, %v3105_v40  ;;  %v3107_v6 = vmul.f32 %v3098_v57, %v3098_v57  ;;  %v3108_v42 = vmul.f32 %v3099_v1, %v3099_v1 }
 0xaa3   : > { %v3095_v44 = vadd.f32 %v3087_v5, %v3079_v0  ;;  %v3103_v9 = vmul.f32 %v3094_v13, %v3094_v13  ;;  %v3146_v19 = vrot.slane %v3100_v18, %v3145_v16  ;;  %v3150_v20 = vrot.slane %v3100_v18, %v3149_v17 }
 0xaa4   : > { %v3109_v12 = vadd.f32 %v3102_v4, %v3101_v3  ;;  %3116 = vadd.xlane.f32.xlu1 %v3115_v43  ;;  %v3118_v7 = vadd.f32 %v3108_v42, %v3107_v6 }
 0xaa5   : > { %v3104_v11 = vmul.f32 %v3095_v44, %v3095_v44 }
 0xaa6   : > { %3110 = vadd.xlane.f32.xlu0 %v3109_v12 }
 0xaa7   : > { %v3112_v10 = vadd.f32 %v3104_v11, %v3103_v9 }
 0xaa8   : > { %3119 = vadd.xlane.f32.xlu1 %v3118_v7 }
 0xaaa   : > { %3113 = vadd.xlane.f32.xlu0 %v3112_v10 }
 0xb2d   : > { %v3117_v46 = vpop.xlane.xlu1 %3116 }
 0xb2e   : > { %v3124_v50 = vmul.f32 0.00390625, %v3117_v46 }
 0xb2f   : > { %v3111_v51 = vpop.xlane.xlu0 %3110 }
 0xb30   : > { %v3122_v52 = vmul.f32 0.00390625, %v3111_v51  ;;  %v3128_v45 = vadd.f32 1e-05, %v3124_v50 }
 0xb31   : > { %v3120_v8 = vpop.xlane.xlu1 %3119 }
 0xb32   : > { %v3126_v53 = vadd.f32 1e-05, %v3122_v52  ;;  %4314 = vrsqrt.f32 %v3128_v45  ;;  %v3125_v63 = vmul.f32 0.00390625, %v3120_v8 }
 0xb33   : > { %v3114_v14 = vpop.xlane.xlu0 %3113 }
 0xb34   : > { %4316 = vrsqrt.f32 %v3126_v53  ;;  %v3123_v56 = vmul.f32 0.00390625, %v3114_v14  ;;  %v3129_v60 = vadd.f32 1e-05, %v3125_v63 }
 0xb36   : > { %v3127_v61 = vadd.f32 1e-05, %v3123_v56  ;;  %4318 = vrsqrt.f32 %v3129_v60 }
 0xb38   : > { %4320 = vrsqrt.f32 %v3127_v61 }
 0xb3f   : > { %v4315_v21 = vpop.eup %4314 }
 0xb40   : > { %v3138_v23 = vmul.f32 %v4315_v21, %v3096_v33  ;;  %v3139_v24 = vmul.f32 %v4315_v21, %v3097_v39 }
 0xb41   : > { %v4317_v22 = vpop.eup %4316 }
 0xb42   : > { %v3134_v25 = vmul.f32 %v4317_v22, %v3092_v41  ;;  %v3135_v26 = vmul.f32 %v4317_v22, %v3093_v47  ;;  %v3157_v27 = vmul.f32 %v3146_v19, %v3138_v23  ;;  %v3158_v28 = vmul.f32 %v3150_v20, %v3139_v24 }
 0xb43   : > { %v4319_v29 = vpop.eup %4318 }
 0xb44   : > { %v3153_v30 = vmul.f32 %v3146_v19, %v3134_v25  ;;  %v3154_v31 = vmul.f32 %v3150_v20, %v3135_v26  ;;  %3165 = vst [vmem:[#allocation14 + $0x20] sm:$0xff] %v3157_v27  ;;  %3166 = vst [vmem:[#allocation14 + $0x28] sm:$0xff] %v3158_v28  ;;  %v3140_v32 = vmul.f32 %v4319_v29, %v3098_v57 }
 0xb45   : > { %v4321_v58 = vpop.eup %4320  ;;  %v3141_v34 = vmul.f32 %v4319_v29, %v3099_v1 }
 0xb46   : > { %3161 = vst [vmem:[#allocation14] sm:$0xff] %v3153_v30  ;;  %3162 = vst [vmem:[#allocation14 + $0x8] sm:$0xff] %v3154_v31  ;;  %v3136_v35 = vmul.f32 %v4321_v58, %v3094_v13  ;;  %v3137_v36 = vmul.f32 %v4321_v58, %v3095_v44  ;;  %v3159_v37 = vmul.f32 %v3146_v19, %v3140_v32 }
 0xb47   : > { %v3160_v38 = vmul.f32 %v3150_v20, %v3141_v34 }
 0xb48   : > { %v3155_v33 = vmul.f32 %v3146_v19, %v3136_v35  ;;  %v3156_v39 = vmul.f32 %v3150_v20, %v3137_v36  ;;  %3167 = vst [vmem:[#allocation14 + $0x30] sm:$0xff] %v3159_v37 }
 0xb49   : > { %3168 = vst [vmem:[#allocation14 + $0x38] sm:$0xff] %v3160_v38 }
 0xb4a   : > { %3163 = vst [vmem:[#allocation14 + $0x10] sm:$0xff] %v3155_v33  ;;  %3164 = vst [vmem:[#allocation14 + $0x18] sm:$0xff] %v3156_v39 }
 0xb4b PF: > { %s5471_s3 = sld [smem:[#allocation28_spill]] }
 0xb51   : > { %p3777_p4 = scmp.eq.s32.totalorder %s5471_s3, 3 }
 0xb53   : > { %p4462_p8 = pnand %p4446_p6, %p3777_p4 }
 0xb55   : > { %p4463_p13 = pneg %p4462_p8 }
 0xb57   : > { %p4470_p1 = pnand %p4463_p13, %p4915_p9 }
 0xb59   : > { %4473 = shalt.err (!%p4470_p1)
}
 0xb5a   : > { %s4609_s7 = smov 256   ;;  %s4610_s30 = smov 16  }
 0xb5b   : > { %s5472_s26 = sld [smem:[#allocation38_spill]] }
 0xb61   : > { %3760 = dma.vmem_to_hbm [thread:$0]  (%p3777_p4), %s4889_s2, 1024, %s5472_s26, [#allocation8], %s4609_s7, %s4609_s7, %s4610_s30  }
 0xb62   : > { %4549 = dma.done.wait (%p3777_p4), [#allocation8], 1024  }
 0xb63   : > { %4551 = vsyncadd (%p3777_p4), [#allocation8], 4294966272 }
 0xb64 PF: > { %s28_s15 = sadd.s32 1, %s4594_s15   ;;  %s5473_s27 = sld [smem:[#allocation25_spill]] }
 0xb65   : > { %p25_p2 = scmp.ge.s32.totalorder %s28_s15, 6   ;;  %s5474_s5 = sld [smem:[#allocation29_spill]] }
 0xb66   : > { %s5475_s28 = smov %s4562_s29  ;;  %s5476_s29 = smov %s4814_s19 }
 0xb67   : > { %s5477_s30 = smov %s4570_s9  ;;  %s5478_s9 = smov %s4574_s10 }
 0xb68   : > { %s5479_s10 = smov %s4811_s6  ;;  %s5480_s11 = smov %s4586_s13 }
 0xb69   : > { %s5481_s12 = smov %s4590_s14  ;;  %s5483_s14 = smov %s5489_s22 }
 0xb6a   :  { %27 = sbr.rel (!%p25_p2) target bundleno = 21 (0x15), region = 150 }
 0xb6b   : > { %s5482_s13 = smov %s5474_s5 }
 0xb6f   :  { %3195 = vsyncpa [#allocation7], 1 }
 0xb70   :  { %3197 = vsyncpa [#allocation7 + $0x1], 1 }
 0xb71   :  { %3198 = vsyncpa [#allocation10], 1 }
 0xb72   :  { %3200 = vsyncpa [#allocation10 + $0x1], 1 }
 0xb73   :  { %3201 = vsyncpa [#allocation13], 1 }
 0xb74   :  { %3203 = vsyncpa [#allocation13 + $0x1], 1 }
 0xb75   :  { %3204 = vsyncpa [#allocation8], 1 }
 0xb76   :  { %3206 = vsyncpa [#allocation8 + $0x1], 1 }
 0xb77   :  { %3207 = vsyncmov [#allocation5] }
 0xb7a   :  { %s3208_s6 = vpop.sfrf %3207 }
 0xb7b   :  { %p3635_p6 = scmp.ne.s32.totalorder %s3208_s6, 0 }
 0xb7d   :  { %3212 = shalt.err (%p3635_p6)  }

</bundles_post_ra>
